<compile_context>
chip_gen: v6e
topology: v6e:2x2x1
jax: 0.10.0
libtpu: 0.0.40
codegen_flags: <defaults>
</compile_context>

<pallas_src>
import functools

import jax
import jax.numpy as jnp
from jax.experimental import pallas as pl
from jax.experimental.pallas import tpu as pltpu


# --------------------------- fast arctan approximation -----------------------

_HALF_PI = 1.5707963267948966
# Abramowitz & Stegun 4.4.47: odd degree-9 minimax for atan on [-1, 1],
# |error| <= ~1.2e-5.
_ATAN_C1 = 0.9998660
_ATAN_C3 = -0.3302995
_ATAN_C5 = 0.1801410
_ATAN_C7 = -0.0851330
_ATAN_C9 = 0.0208351


def _atan_approx(x):
    """arctan(x) for all real x, accurate to ~1e-5 (f32) / bf16 rounding (bf16).

    Range reduction: |x| > 1  ->  atan(x) = sign(x)*pi/2 - atan(1/x), with the
    reciprocal on the EUP slot (essentially free); the polynomial runs on the
    VPU in x.dtype, so a bf16 input gives genuinely packed bf16 VALU work.
    """
    dt = x.dtype
    ax = jnp.abs(x)
    big = ax > 1.0
    r = pl.reciprocal(x.astype(jnp.float32), approx=True)      # EUP slot
    if dt == jnp.float32:
        # One Newton step -> near-full f32 precision (approx recip error ^2).
        r = r * (2.0 - x * r)
    t = jnp.where(big, r.astype(dt), x)                          # |t| <= 1
    u = t * t
    p = _ATAN_C9
    p = p * u + _ATAN_C7
    p = p * u + _ATAN_C5
    p = p * u + _ATAN_C3
    p = p * u + _ATAN_C1
    p = p * t
    sgn_half_pi = jnp.where(x < 0, -_HALF_PI, _HALF_PI).astype(dt)
    return jnp.where(big, sgn_half_pi - p, p)


# ----------------------------- Pallas kernel --------------------------------

def _cppn_kernel(x_ref, w_in_ref, b_in_ref, w1_ref, w2_ref, b_ref,
                 w1_out_ref, w2_out_ref, b_out_ref, o_ref, *, num_layers):
    # x_ref:      [2, TM]        tile of pixel coordinates (channel-major)
    # w_in_ref:   [C, 2]         input 1x1 conv, channel-major matmul form
    # b_in_ref:   [C, 1]
    # w1_ref:     [L, C, C]      folded inner weights (first activation half)
    # w2_ref:     [L, C, C]      folded inner weights (second activation half)
    # b_ref:      [L, C, 1]      folded inner biases (f32)
    # w1_out_ref: [3, C]
    # w2_out_ref: [3, C]
    # b_out_ref:  [3, 1]
    # o_ref:      [3, TM]
    cd = w_in_ref.dtype                       # compute dtype (f32 or bf16)
    x = x_ref[...].astype(cd)

    h = jnp.dot(w_in_ref[...], x,
                preferred_element_type=jnp.float32) + b_in_ref[...]   # [C, TM] f32
    for i in range(num_layers):                                        # static unroll
        a = _atan_approx(h.astype(cd))                                 # [C, TM] cd
        h = (jnp.dot(w1_ref[i], a, preferred_element_type=jnp.float32)
             + jnp.dot(w2_ref[i], a * a, preferred_element_type=jnp.float32)
             + b_ref[i])                                               # [C, TM] f32
    a = _atan_approx(h.astype(cd))
    out = (jnp.dot(w1_out_ref[...], a, preferred_element_type=jnp.float32)
           + jnp.dot(w2_out_ref[...], a * a, preferred_element_type=jnp.float32)
           + b_out_ref[...])                                           # [3, TM]
    o_ref[...] = out.astype(o_ref.dtype)


# ------------------------- parameter preparation -----------------------------

def _prepare_params(params, compute_dtype=jnp.float32):
    """Fold the composite-activation constants into channel-major weights.

    Input params are PyTorch-style: weights [C_out, C_in], biases [C_out].
    The kernel works channel-major ([C_out, C_in] @ [C_in, TM]) so no
    transpose is needed; only the activation fold and bias reshape.
    Biases (accumulators) stay f32 even when compute_dtype is bf16.
    """
    w_in, b_in, w_inner, b_inner, w_out, b_out = params
    c = w_in.shape[0]

    w1_inner = w_inner[:, :, :c] * (1.0 / 0.67)                 # [L, C, C]
    w2_inner = w_inner[:, :, c:] * (1.0 / 0.396)                # [L, C, C]
    b_inner_f = (b_inner - 0.45 * jnp.sum(w2_inner, axis=2))[:, :, None]

    w1_out = w_out[:, :c] * (1.0 / 0.67)                        # [3, C]
    w2_out = w_out[:, c:] * (1.0 / 0.396)                       # [3, C]
    b_out_f = (b_out - 0.45 * jnp.sum(w2_out, axis=1))[:, None]

    return (w_in.astype(compute_dtype), b_in[:, None],
            w1_inner.astype(compute_dtype), w2_inner.astype(compute_dtype),
            b_inner_f,
            w1_out.astype(compute_dtype), w2_out.astype(compute_dtype),
            b_out_f)


def _pick_tile_m(p, cap=8192):
    """Large lane-dense tile with an EVEN number of grid steps (v7x megacore).

    Returns (tile_m, num_steps).  tile_m is a multiple of 128 and capped so the
    kernel's [C, TM] f32 temporaries stay well inside scoped VMEM.
    """
    steps = max(2, pl.cdiv(p, cap))
    if steps % 2:
        steps += 1
    tile = max(128, pl.cdiv(pl.cdiv(p, steps), 128) * 128)
    return min(cap, tile), steps


# ------------------------------- forward -------------------------------------

def cppn_forward_flat(x_flat, params, *, tile_m=None, compute_dtype=jnp.float32):
    """Channel-major API: x_flat [2, P] f32 -> [3, P] f32 (no NCHW transposes)."""
    (w_in, b_in, w1_inner, w2_inner, b_inner,
     w1_out, w2_out, b_out) = _prepare_params(params, compute_dtype)
    num_layers = w1_inner.shape[0]

    cin, p = x_flat.shape
    assert cin == 2
    if tile_m is None:
        tile_m, steps = _pick_tile_m(p)
    else:
        steps = pl.cdiv(p, tile_m)
    p_pad = steps * tile_m
    if p_pad != p:
        x_flat = jnp.pad(x_flat, ((0, 0), (0, p_pad - p)))

    kernel = functools.partial(_cppn_kernel, num_layers=num_layers)

    out_flat = pl.pallas_call(
        kernel,
        out_shape=jax.ShapeDtypeStruct((3, p_pad), jnp.float32),
        grid_spec=pltpu.PrefetchScalarGridSpec(
            num_scalar_prefetch=0,
            grid=(steps,),
            in_specs=[
                pl.BlockSpec((cin, tile_m), lambda i: (0, i)),        # x tile
                # grid-invariant weights/biases: stay resident in VMEM
                pl.BlockSpec(w_in.shape, lambda i: (0, 0)),
                pl.BlockSpec(b_in.shape, lambda i: (0, 0)),
                pl.BlockSpec(w1_inner.shape, lambda i: (0, 0, 0)),
                pl.BlockSpec(w2_inner.shape, lambda i: (0, 0, 0)),
                pl.BlockSpec(b_inner.shape, lambda i: (0, 0, 0)),
                pl.BlockSpec(w1_out.shape, lambda i: (0, 0)),
                pl.BlockSpec(w2_out.shape, lambda i: (0, 0)),
                pl.BlockSpec(b_out.shape, lambda i: (0, 0)),
            ],
            out_specs=pl.BlockSpec((3, tile_m), lambda i: (0, i)),    # lane-dense store
        ),
        compiler_params=pltpu.CompilerParams(
            dimension_semantics=("parallel",),
            vmem_limit_bytes=48 * 1024 * 1024),
    )(x_flat, w_in, b_in, w1_inner, w2_inner, b_inner, w1_out, w2_out, b_out)

    return out_flat[:, :p]


def cppn_forward(x_nchw, params, *, tile_m=None, compute_dtype=jnp.float32):
    """Runs the CPPN forward pass. x_nchw: [N, 2, H, W] float32 -> [N, 3, H, W].

    (Callers that already hold channel-major [2, P] data can use
    cppn_forward_flat directly and skip the wrapper transposes.)
    """
    n, cin, hh, ww = x_nchw.shape
    assert cin == 2
    x_flat = jnp.transpose(x_nchw, (1, 0, 2, 3)).reshape(cin, n * hh * ww)
    out_flat = cppn_forward_flat(x_flat, params, tile_m=tile_m,
                                 compute_dtype=compute_dtype)
    return jnp.transpose(out_flat.reshape(3, n, hh, ww), (1, 0, 2, 3))


# ------------------------ parameter init (deterministic) --------------------

def init_cppn_params(key, num_layers, num_channels):
    """Mirrors CPPN.__init__: kaiming_normal_(nonlinearity='linear') weights,
    PyTorch-default uniform(-1/sqrt(fan_in), 1/sqrt(fan_in)) biases,
    zero output-layer weight.  Weights stored PyTorch-style [C_out, C_in]."""
    mult = 2
    keys = jax.random.split(key, 2 * num_layers + 4)

    def kaiming(k, c_out, c_in):
        std = 1.0 / jnp.sqrt(float(c_in))            # gain=1 for 'linear'
        return jax.random.normal(k, (c_out, c_in), jnp.float32) * std

    def bias(k, c_out, fan_in):
        bound = 1.0 / jnp.sqrt(float(fan_in))
        return jax.random.uniform(k, (c_out,), jnp.float32, -bound, bound)

    w_in = kaiming(keys[0], num_channels, 2)                         # [C, 2]
    b_in = bias(keys[1], num_channels, 2)                            # [C]
    w_inner = jnp.stack([kaiming(keys[2 + 2 * i],
                                 num_channels, mult * num_channels)
                         for i in range(num_layers)])                # [L, C, 2C]
    b_inner = jnp.stack([bias(keys[3 + 2 * i],
                              num_channels, mult * num_channels)
                         for i in range(num_layers)])                # [L, C]
    w_out = jnp.zeros((3, mult * num_channels), jnp.float32)         # zero init
    b_out = bias(keys[-1], 3, mult * num_channels)                   # [3]
    return w_in, b_in, w_inner, b_inner, w_out, b_out


# ------------------------------ pure-JAX reference ---------------------------

def _act_ref(h):
    a = jnp.arctan(h)
    return jnp.concatenate([a / 0.67, (a * a - 0.45) / 0.396], axis=-1)


def cppn_reference(x_nchw, params):
    """Direct (unfolded) implementation of the original module, f32-highest."""
    w_in, b_in, w_inner, b_inner, w_out, b_out = params
    n, cin, hh, ww = x_nchw.shape
    h = jnp.transpose(x_nchw, (0, 2, 3, 1)).reshape(-1, cin)           # [P, 2]
    h = _act_ref(jnp.dot(h, w_in.T, precision="highest") + b_in)
    for i in range(w_inner.shape[0]):
        h = _act_ref(jnp.dot(h, w_inner[i].T, precision="highest") + b_inner[i])
    out = jnp.dot(h, w_out.T, precision="highest") + b_out
    return jnp.transpose(out.reshape(n, hh, ww, 3), (0, 3, 1, 2))


# ----------------------------------- main ------------------------------------

if __name__ == "__main__":
    num_layers = 3
    num_channels = 32
    N, H, W = 2, 16, 16            # input x: [2, 2, 16, 16] (NCHW, 2 coord chans)

    key = jax.random.PRNGKey(0)
    k_param, k_x, k_wout = jax.random.split(key, 3)
    params = init_cppn_params(k_param, num_layers, num_channels)
    x = jax.random.normal(k_x, (N, 2, H, W), jnp.float32)

    # 1) Spec-faithful params (zero output weight), f32 path.
    out = jax.block_until_ready(cppn_forward(x, params))
    ref = cppn_reference(x, params)
    assert out.shape == (N, 3, H, W), out.shape
    assert jnp.allclose(out, ref, atol=2e-3, rtol=2e-3), "mismatch vs reference"

    # 2) Zero-init output weight makes the final matmul degenerate; re-check
    #    with a random output layer so the full folded chain (incl. the custom
    #    atan approximation) is actually exercised.
    w_in, b_in, w_inner, b_inner, w_out, b_out = params
    w_out_rand = jax.random.normal(k_wout, w_out.shape, jnp.float32) \
        / jnp.sqrt(2.0 * num_channels)
    params_rand = (w_in, b_in, w_inner, b_inner, w_out_rand, b_out)
    out2 = jax.block_until_ready(cppn_forward(x, params_rand))
    ref2 = cppn_reference(x, params_rand)
    max_err = float(jnp.max(jnp.abs(out2 - ref2)))
    assert jnp.allclose(out2, ref2, atol=2e-3, rtol=2e-3), \
        f"mismatch vs reference (max abs err {max_err})"

    # 3) Exercise the genuinely-bf16 activation-chain path (v6e/v7x fast path)
    #    with a loose, reduced-precision-appropriate sanity bound.
    out3 = jax.block_until_ready(
        cppn_forward(x, params_rand, compute_dtype=jnp.bfloat16))
    assert bool(jnp.all(jnp.isfinite(out3))), "bf16 path produced non-finite values"
    err3 = jnp.abs(out3 - ref2)
    mean_err3, max_err3 = float(jnp.mean(err3)), float(jnp.max(err3))
    assert mean_err3 < 6e-2 and max_err3 < 3.5e-1, \
        f"bf16 path too far from reference (mean {mean_err3}, max {max_err3})"

    print("KERNEL_OK")
</pallas_src>

<mosaic_0001>
module attributes {stable_mosaic.version = 11 : i64} {
  func.func @_cppn_kernel(%arg0: i32, %arg1: memref<2x256xf32, #tpu.memory_space<vmem>>, %arg2: memref<32x2xf32, #tpu.memory_space<vmem>>, %arg3: memref<32x1xf32, #tpu.memory_space<vmem>>, %arg4: memref<3x32x32xf32, #tpu.memory_space<vmem>>, %arg5: memref<3x32x32xf32, #tpu.memory_space<vmem>>, %arg6: memref<3x32x1xf32, #tpu.memory_space<vmem>>, %arg7: memref<3x32xf32, #tpu.memory_space<vmem>>, %arg8: memref<3x32xf32, #tpu.memory_space<vmem>>, %arg9: memref<3x1xf32, #tpu.memory_space<vmem>>, %arg10: memref<3x256xf32, #tpu.memory_space<vmem>>) attributes {dimension_semantics = [#tpu.dimension_semantics<parallel>], iteration_bounds = array<i64: 2>, scalar_prefetch = 0 : i64, scratch_operands = 0 : i64, tpu.core_type = #tpu.core_type<tc>, window_params = [{transform_indices = @transform_0, window_bounds = array<i64: 2, 256>}, {pipeline_mode = #tpu.pipeline_mode<synchronous>, transform_indices = @transform_1, window_bounds = array<i64: 32, 2>}, {pipeline_mode = #tpu.pipeline_mode<synchronous>, transform_indices = @transform_2, window_bounds = array<i64: 32, 1>}, {pipeline_mode = #tpu.pipeline_mode<synchronous>, transform_indices = @transform_3, window_bounds = array<i64: 3, 32, 32>}, {pipeline_mode = #tpu.pipeline_mode<synchronous>, transform_indices = @transform_4, window_bounds = array<i64: 3, 32, 32>}, {pipeline_mode = #tpu.pipeline_mode<synchronous>, transform_indices = @transform_5, window_bounds = array<i64: 3, 32, 1>}, {pipeline_mode = #tpu.pipeline_mode<synchronous>, transform_indices = @transform_6, window_bounds = array<i64: 3, 32>}, {pipeline_mode = #tpu.pipeline_mode<synchronous>, transform_indices = @transform_7, window_bounds = array<i64: 3, 32>}, {pipeline_mode = #tpu.pipeline_mode<synchronous>, transform_indices = @transform_8, window_bounds = array<i64: 3, 1>}, {transform_indices = @transform_9, window_bounds = array<i64: 3, 256>}]} {
    %c0 = arith.constant 0 : index
    %c0_0 = arith.constant 0 : index
    %0 = vector.load %arg1[%c0, %c0_0] : memref<2x256xf32, #tpu.memory_space<vmem>>, vector<2x256xf32>
    %c0_1 = arith.constant 0 : index
    %c0_2 = arith.constant 0 : index
    %1 = vector.load %arg2[%c0_1, %c0_2] : memref<32x2xf32, #tpu.memory_space<vmem>>, vector<32x2xf32>
    %cst = arith.constant dense<0.000000e+00> : vector<32x256xf32>
    %2 = tpu.matmul %1, %0, %cst {dimension_numbers = #tpu.dot_dimension_numbers<[1], [0], [0], [1], [0, 0, 1, 1], [], []>} : vector<32x2xf32>, vector<2x256xf32>, vector<32x256xf32> -> vector<32x256xf32>
    %c0_3 = arith.constant 0 : index
    %c0_4 = arith.constant 0 : index
    %3 = vector.load %arg3[%c0_3, %c0_4] : memref<32x1xf32, #tpu.memory_space<vmem>>, vector<32x1xf32>
    %4 = vector.broadcast %3 : vector<32x1xf32> to vector<32x256xf32>
    %5 = arith.addf %2, %4 : vector<32x256xf32>
    %6 = math.absf %5 : vector<32x256xf32>
    %cst_5 = arith.constant 1.000000e+00 : f32
    %7 = vector.broadcast %cst_5 : f32 to vector<32x256xf32>
    %8 = arith.cmpf ogt, %6, %7 : vector<32x256xf32>
    %9 = tpu.reciprocal %5 {approx = true} : vector<32x256xf32> -> vector<32x256xf32>
    %10 = arith.mulf %5, %9 : vector<32x256xf32>
    %cst_6 = arith.constant 2.000000e+00 : f32
    %11 = vector.broadcast %cst_6 : f32 to vector<32x256xf32>
    %12 = arith.subf %11, %10 : vector<32x256xf32>
    %13 = arith.mulf %9, %12 : vector<32x256xf32>
    %14 = arith.select %8, %13, %5 : vector<32x256xi1>, vector<32x256xf32>
    %15 = arith.mulf %14, %14 : vector<32x256xf32>
    %cst_7 = arith.constant 2.083510e-02 : f32
    %16 = vector.broadcast %cst_7 : f32 to vector<32x256xf32>
    %17 = arith.mulf %16, %15 : vector<32x256xf32>
    %cst_8 = arith.constant -8.513300e-02 : f32
    %18 = vector.broadcast %cst_8 : f32 to vector<32x256xf32>
    %19 = arith.addf %17, %18 : vector<32x256xf32>
    %20 = arith.mulf %19, %15 : vector<32x256xf32>
    %cst_9 = arith.constant 1.801410e-01 : f32
    %21 = vector.broadcast %cst_9 : f32 to vector<32x256xf32>
    %22 = arith.addf %20, %21 : vector<32x256xf32>
    %23 = arith.mulf %22, %15 : vector<32x256xf32>
    %cst_10 = arith.constant -0.330299497 : f32
    %24 = vector.broadcast %cst_10 : f32 to vector<32x256xf32>
    %25 = arith.addf %23, %24 : vector<32x256xf32>
    %26 = arith.mulf %25, %15 : vector<32x256xf32>
    %cst_11 = arith.constant 9.998660e-01 : f32
    %27 = vector.broadcast %cst_11 : f32 to vector<32x256xf32>
    %28 = arith.addf %26, %27 : vector<32x256xf32>
    %29 = arith.mulf %28, %14 : vector<32x256xf32>
    %cst_12 = arith.constant 0.000000e+00 : f32
    %30 = vector.broadcast %cst_12 : f32 to vector<32x256xf32>
    %31 = arith.cmpf olt, %5, %30 : vector<32x256xf32>
    %cst_13 = arith.constant -1.57079637 : f32
    %cst_14 = arith.constant 1.57079637 : f32
    %32 = vector.broadcast %cst_13 : f32 to vector<32x256xf32>
    %33 = vector.broadcast %cst_14 : f32 to vector<32x256xf32>
    %34 = arith.select %31, %32, %33 : vector<32x256xi1>, vector<32x256xf32>
    %35 = arith.subf %34, %29 : vector<32x256xf32>
    %36 = arith.select %8, %35, %29 : vector<32x256xi1>, vector<32x256xf32>
    %c0_15 = arith.constant 0 : index
    %c0_16 = arith.constant 0 : index
    %c0_17 = arith.constant 0 : index
    %37 = vector.load %arg4[%c0_15, %c0_16, %c0_17] : memref<3x32x32xf32, #tpu.memory_space<vmem>>, vector<1x32x32xf32>
    %38 = vector.shape_cast %37 : vector<1x32x32xf32> to vector<32x32xf32>
    %cst_18 = arith.constant dense<0.000000e+00> : vector<32x256xf32>
    %39 = tpu.matmul %38, %36, %cst_18 {dimension_numbers = #tpu.dot_dimension_numbers<[1], [0], [0], [1], [0, 0, 1, 1], [], []>} : vector<32x32xf32>, vector<32x256xf32>, vector<32x256xf32> -> vector<32x256xf32>
    %c0_19 = arith.constant 0 : index
    %c0_20 = arith.constant 0 : index
    %c0_21 = arith.constant 0 : index
    %40 = vector.load %arg5[%c0_19, %c0_20, %c0_21] : memref<3x32x32xf32, #tpu.memory_space<vmem>>, vector<1x32x32xf32>
    %41 = vector.shape_cast %40 : vector<1x32x32xf32> to vector<32x32xf32>
    %42 = arith.mulf %36, %36 : vector<32x256xf32>
    %cst_22 = arith.constant dense<0.000000e+00> : vector<32x256xf32>
    %43 = tpu.matmul %41, %42, %cst_22 {dimension_numbers = #tpu.dot_dimension_numbers<[1], [0], [0], [1], [0, 0, 1, 1], [], []>} : vector<32x32xf32>, vector<32x256xf32>, vector<32x256xf32> -> vector<32x256xf32>
    %44 = arith.addf %39, %43 : vector<32x256xf32>
    %c0_23 = arith.constant 0 : index
    %c0_24 = arith.constant 0 : index
    %c0_25 = arith.constant 0 : index
    %45 = vector.load %arg6[%c0_23, %c0_24, %c0_25] : memref<3x32x1xf32, #tpu.memory_space<vmem>>, vector<1x32x1xf32>
    %46 = vector.shape_cast %45 : vector<1x32x1xf32> to vector<32x1xf32>
    %47 = vector.broadcast %46 : vector<32x1xf32> to vector<32x256xf32>
    %48 = arith.addf %44, %47 : vector<32x256xf32>
    %49 = math.absf %48 : vector<32x256xf32>
    %cst_26 = arith.constant 1.000000e+00 : f32
    %50 = vector.broadcast %cst_26 : f32 to vector<32x256xf32>
    %51 = arith.cmpf ogt, %49, %50 : vector<32x256xf32>
    %52 = tpu.reciprocal %48 {approx = true} : vector<32x256xf32> -> vector<32x256xf32>
    %53 = arith.mulf %48, %52 : vector<32x256xf32>
    %cst_27 = arith.constant 2.000000e+00 : f32
    %54 = vector.broadcast %cst_27 : f32 to vector<32x256xf32>
    %55 = arith.subf %54, %53 : vector<32x256xf32>
    %56 = arith.mulf %52, %55 : vector<32x256xf32>
    %57 = arith.select %51, %56, %48 : vector<32x256xi1>, vector<32x256xf32>
    %58 = arith.mulf %57, %57 : vector<32x256xf32>
    %cst_28 = arith.constant 2.083510e-02 : f32
    %59 = vector.broadcast %cst_28 : f32 to vector<32x256xf32>
    %60 = arith.mulf %59, %58 : vector<32x256xf32>
    %cst_29 = arith.constant -8.513300e-02 : f32
    %61 = vector.broadcast %cst_29 : f32 to vector<32x256xf32>
    %62 = arith.addf %60, %61 : vector<32x256xf32>
    %63 = arith.mulf %62, %58 : vector<32x256xf32>
    %cst_30 = arith.constant 1.801410e-01 : f32
    %64 = vector.broadcast %cst_30 : f32 to vector<32x256xf32>
    %65 = arith.addf %63, %64 : vector<32x256xf32>
    %66 = arith.mulf %65, %58 : vector<32x256xf32>
    %cst_31 = arith.constant -0.330299497 : f32
    %67 = vector.broadcast %cst_31 : f32 to vector<32x256xf32>
    %68 = arith.addf %66, %67 : vector<32x256xf32>
    %69 = arith.mulf %68, %58 : vector<32x256xf32>
    %cst_32 = arith.constant 9.998660e-01 : f32
    %70 = vector.broadcast %cst_32 : f32 to vector<32x256xf32>
    %71 = arith.addf %69, %70 : vector<32x256xf32>
    %72 = arith.mulf %71, %57 : vector<32x256xf32>
    %cst_33 = arith.constant 0.000000e+00 : f32
    %73 = vector.broadcast %cst_33 : f32 to vector<32x256xf32>
    %74 = arith.cmpf olt, %48, %73 : vector<32x256xf32>
    %cst_34 = arith.constant -1.57079637 : f32
    %cst_35 = arith.constant 1.57079637 : f32
    %75 = vector.broadcast %cst_34 : f32 to vector<32x256xf32>
    %76 = vector.broadcast %cst_35 : f32 to vector<32x256xf32>
    %77 = arith.select %74, %75, %76 : vector<32x256xi1>, vector<32x256xf32>
    %78 = arith.subf %77, %72 : vector<32x256xf32>
    %79 = arith.select %51, %78, %72 : vector<32x256xi1>, vector<32x256xf32>
    %c1 = arith.constant 1 : index
    %c0_36 = arith.constant 0 : index
    %c0_37 = arith.constant 0 : index
    %80 = vector.load %arg4[%c1, %c0_36, %c0_37] : memref<3x32x32xf32, #tpu.memory_space<vmem>>, vector<1x32x32xf32>
    %81 = vector.shape_cast %80 : vector<1x32x32xf32> to vector<32x32xf32>
    %cst_38 = arith.constant dense<0.000000e+00> : vector<32x256xf32>
    %82 = tpu.matmul %81, %79, %cst_38 {dimension_numbers = #tpu.dot_dimension_numbers<[1], [0], [0], [1], [0, 0, 1, 1], [], []>} : vector<32x32xf32>, vector<32x256xf32>, vector<32x256xf32> -> vector<32x256xf32>
    %c1_39 = arith.constant 1 : index
    %c0_40 = arith.constant 0 : index
    %c0_41 = arith.constant 0 : index
    %83 = vector.load %arg5[%c1_39, %c0_40, %c0_41] : memref<3x32x32xf32, #tpu.memory_space<vmem>>, vector<1x32x32xf32>
    %84 = vector.shape_cast %83 : vector<1x32x32xf32> to vector<32x32xf32>
    %85 = arith.mulf %79, %79 : vector<32x256xf32>
    %cst_42 = arith.constant dense<0.000000e+00> : vector<32x256xf32>
    %86 = tpu.matmul %84, %85, %cst_42 {dimension_numbers = #tpu.dot_dimension_numbers<[1], [0], [0], [1], [0, 0, 1, 1], [], []>} : vector<32x32xf32>, vector<32x256xf32>, vector<32x256xf32> -> vector<32x256xf32>
    %87 = arith.addf %82, %86 : vector<32x256xf32>
    %c1_43 = arith.constant 1 : index
    %c0_44 = arith.constant 0 : index
    %c0_45 = arith.constant 0 : index
    %88 = vector.load %arg6[%c1_43, %c0_44, %c0_45] : memref<3x32x1xf32, #tpu.memory_space<vmem>>, vector<1x32x1xf32>
    %89 = vector.shape_cast %88 : vector<1x32x1xf32> to vector<32x1xf32>
    %90 = vector.broadcast %89 : vector<32x1xf32> to vector<32x256xf32>
    %91 = arith.addf %87, %90 : vector<32x256xf32>
    %92 = math.absf %91 : vector<32x256xf32>
    %cst_46 = arith.constant 1.000000e+00 : f32
    %93 = vector.broadcast %cst_46 : f32 to vector<32x256xf32>
    %94 = arith.cmpf ogt, %92, %93 : vector<32x256xf32>
    %95 = tpu.reciprocal %91 {approx = true} : vector<32x256xf32> -> vector<32x256xf32>
    %96 = arith.mulf %91, %95 : vector<32x256xf32>
    %cst_47 = arith.constant 2.000000e+00 : f32
    %97 = vector.broadcast %cst_47 : f32 to vector<32x256xf32>
    %98 = arith.subf %97, %96 : vector<32x256xf32>
    %99 = arith.mulf %95, %98 : vector<32x256xf32>
    %100 = arith.select %94, %99, %91 : vector<32x256xi1>, vector<32x256xf32>
    %101 = arith.mulf %100, %100 : vector<32x256xf32>
    %cst_48 = arith.constant 2.083510e-02 : f32
    %102 = vector.broadcast %cst_48 : f32 to vector<32x256xf32>
    %103 = arith.mulf %102, %101 : vector<32x256xf32>
    %cst_49 = arith.constant -8.513300e-02 : f32
    %104 = vector.broadcast %cst_49 : f32 to vector<32x256xf32>
    %105 = arith.addf %103, %104 : vector<32x256xf32>
    %106 = arith.mulf %105, %101 : vector<32x256xf32>
    %cst_50 = arith.constant 1.801410e-01 : f32
    %107 = vector.broadcast %cst_50 : f32 to vector<32x256xf32>
    %108 = arith.addf %106, %107 : vector<32x256xf32>
    %109 = arith.mulf %108, %101 : vector<32x256xf32>
    %cst_51 = arith.constant -0.330299497 : f32
    %110 = vector.broadcast %cst_51 : f32 to vector<32x256xf32>
    %111 = arith.addf %109, %110 : vector<32x256xf32>
    %112 = arith.mulf %111, %101 : vector<32x256xf32>
    %cst_52 = arith.constant 9.998660e-01 : f32
    %113 = vector.broadcast %cst_52 : f32 to vector<32x256xf32>
    %114 = arith.addf %112, %113 : vector<32x256xf32>
    %115 = arith.mulf %114, %100 : vector<32x256xf32>
    %cst_53 = arith.constant 0.000000e+00 : f32
    %116 = vector.broadcast %cst_53 : f32 to vector<32x256xf32>
    %117 = arith.cmpf olt, %91, %116 : vector<32x256xf32>
    %cst_54 = arith.constant -1.57079637 : f32
    %cst_55 = arith.constant 1.57079637 : f32
    %118 = vector.broadcast %cst_54 : f32 to vector<32x256xf32>
    %119 = vector.broadcast %cst_55 : f32 to vector<32x256xf32>
    %120 = arith.select %117, %118, %119 : vector<32x256xi1>, vector<32x256xf32>
    %121 = arith.subf %120, %115 : vector<32x256xf32>
    %122 = arith.select %94, %121, %115 : vector<32x256xi1>, vector<32x256xf32>
    %c2 = arith.constant 2 : index
    %c0_56 = arith.constant 0 : index
    %c0_57 = arith.constant 0 : index
    %123 = vector.load %arg4[%c2, %c0_56, %c0_57] : memref<3x32x32xf32, #tpu.memory_space<vmem>>, vector<1x32x32xf32>
    %124 = vector.shape_cast %123 : vector<1x32x32xf32> to vector<32x32xf32>
    %cst_58 = arith.constant dense<0.000000e+00> : vector<32x256xf32>
    %125 = tpu.matmul %124, %122, %cst_58 {dimension_numbers = #tpu.dot_dimension_numbers<[1], [0], [0], [1], [0, 0, 1, 1], [], []>} : vector<32x32xf32>, vector<32x256xf32>, vector<32x256xf32> -> vector<32x256xf32>
    %c2_59 = arith.constant 2 : index
    %c0_60 = arith.constant 0 : index
    %c0_61 = arith.constant 0 : index
    %126 = vector.load %arg5[%c2_59, %c0_60, %c0_61] : memref<3x32x32xf32, #tpu.memory_space<vmem>>, vector<1x32x32xf32>
    %127 = vector.shape_cast %126 : vector<1x32x32xf32> to vector<32x32xf32>
    %128 = arith.mulf %122, %122 : vector<32x256xf32>
    %cst_62 = arith.constant dense<0.000000e+00> : vector<32x256xf32>
    %129 = tpu.matmul %127, %128, %cst_62 {dimension_numbers = #tpu.dot_dimension_numbers<[1], [0], [0], [1], [0, 0, 1, 1], [], []>} : vector<32x32xf32>, vector<32x256xf32>, vector<32x256xf32> -> vector<32x256xf32>
    %130 = arith.addf %125, %129 : vector<32x256xf32>
    %c2_63 = arith.constant 2 : index
    %c0_64 = arith.constant 0 : index
    %c0_65 = arith.constant 0 : index
    %131 = vector.load %arg6[%c2_63, %c0_64, %c0_65] : memref<3x32x1xf32, #tpu.memory_space<vmem>>, vector<1x32x1xf32>
    %132 = vector.shape_cast %131 : vector<1x32x1xf32> to vector<32x1xf32>
    %133 = vector.broadcast %132 : vector<32x1xf32> to vector<32x256xf32>
    %134 = arith.addf %130, %133 : vector<32x256xf32>
    %135 = math.absf %134 : vector<32x256xf32>
    %cst_66 = arith.constant 1.000000e+00 : f32
    %136 = vector.broadcast %cst_66 : f32 to vector<32x256xf32>
    %137 = arith.cmpf ogt, %135, %136 : vector<32x256xf32>
    %138 = tpu.reciprocal %134 {approx = true} : vector<32x256xf32> -> vector<32x256xf32>
    %139 = arith.mulf %134, %138 : vector<32x256xf32>
    %cst_67 = arith.constant 2.000000e+00 : f32
    %140 = vector.broadcast %cst_67 : f32 to vector<32x256xf32>
    %141 = arith.subf %140, %139 : vector<32x256xf32>
    %142 = arith.mulf %138, %141 : vector<32x256xf32>
    %143 = arith.select %137, %142, %134 : vector<32x256xi1>, vector<32x256xf32>
    %144 = arith.mulf %143, %143 : vector<32x256xf32>
    %cst_68 = arith.constant 2.083510e-02 : f32
    %145 = vector.broadcast %cst_68 : f32 to vector<32x256xf32>
    %146 = arith.mulf %145, %144 : vector<32x256xf32>
    %cst_69 = arith.constant -8.513300e-02 : f32
    %147 = vector.broadcast %cst_69 : f32 to vector<32x256xf32>
    %148 = arith.addf %146, %147 : vector<32x256xf32>
    %149 = arith.mulf %148, %144 : vector<32x256xf32>
    %cst_70 = arith.constant 1.801410e-01 : f32
    %150 = vector.broadcast %cst_70 : f32 to vector<32x256xf32>
    %151 = arith.addf %149, %150 : vector<32x256xf32>
    %152 = arith.mulf %151, %144 : vector<32x256xf32>
    %cst_71 = arith.constant -0.330299497 : f32
    %153 = vector.broadcast %cst_71 : f32 to vector<32x256xf32>
    %154 = arith.addf %152, %153 : vector<32x256xf32>
    %155 = arith.mulf %154, %144 : vector<32x256xf32>
    %cst_72 = arith.constant 9.998660e-01 : f32
    %156 = vector.broadcast %cst_72 : f32 to vector<32x256xf32>
    %157 = arith.addf %155, %156 : vector<32x256xf32>
    %158 = arith.mulf %157, %143 : vector<32x256xf32>
    %cst_73 = arith.constant 0.000000e+00 : f32
    %159 = vector.broadcast %cst_73 : f32 to vector<32x256xf32>
    %160 = arith.cmpf olt, %134, %159 : vector<32x256xf32>
    %cst_74 = arith.constant -1.57079637 : f32
    %cst_75 = arith.constant 1.57079637 : f32
    %161 = vector.broadcast %cst_74 : f32 to vector<32x256xf32>
    %162 = vector.broadcast %cst_75 : f32 to vector<32x256xf32>
    %163 = arith.select %160, %161, %162 : vector<32x256xi1>, vector<32x256xf32>
    %164 = arith.subf %163, %158 : vector<32x256xf32>
    %165 = arith.select %137, %164, %158 : vector<32x256xi1>, vector<32x256xf32>
    %c0_76 = arith.constant 0 : index
    %c0_77 = arith.constant 0 : index
    %166 = vector.load %arg7[%c0_76, %c0_77] : memref<3x32xf32, #tpu.memory_space<vmem>>, vector<3x32xf32>
    %cst_78 = arith.constant dense<0.000000e+00> : vector<3x256xf32>
    %167 = tpu.matmul %166, %165, %cst_78 {dimension_numbers = #tpu.dot_dimension_numbers<[1], [0], [0], [1], [0, 0, 1, 1], [], []>} : vector<3x32xf32>, vector<32x256xf32>, vector<3x256xf32> -> vector<3x256xf32>
    %c0_79 = arith.constant 0 : index
    %c0_80 = arith.constant 0 : index
    %168 = vector.load %arg8[%c0_79, %c0_80] : memref<3x32xf32, #tpu.memory_space<vmem>>, vector<3x32xf32>
    %169 = arith.mulf %165, %165 : vector<32x256xf32>
    %cst_81 = arith.constant dense<0.000000e+00> : vector<3x256xf32>
    %170 = tpu.matmul %168, %169, %cst_81 {dimension_numbers = #tpu.dot_dimension_numbers<[1], [0], [0], [1], [0, 0, 1, 1], [], []>} : vector<3x32xf32>, vector<32x256xf32>, vector<3x256xf32> -> vector<3x256xf32>
    %171 = arith.addf %167, %170 : vector<3x256xf32>
    %c0_82 = arith.constant 0 : index
    %c0_83 = arith.constant 0 : index
    %172 = vector.load %arg9[%c0_82, %c0_83] : memref<3x1xf32, #tpu.memory_space<vmem>>, vector<3x1xf32>
    %173 = vector.broadcast %172 : vector<3x1xf32> to vector<3x256xf32>
    %174 = arith.addf %171, %173 : vector<3x256xf32>
    %c0_84 = arith.constant 0 : index
    %c0_85 = arith.constant 0 : index
    %175 = vector.load %arg10[%c0_84, %c0_85] : memref<3x256xf32, #tpu.memory_space<vmem>>, vector<3x256xf32>
    tpu.vector_store %arg10[%c0_84, %c0_85], %174 {strides = array<i32>} : memref<3x256xf32, #tpu.memory_space<vmem>>, vector<3x256xf32>,
    return
  }
  func.func @transform_0(%arg0: i32) -> (i32, i32) {
    %c0_i32 = arith.constant 0 : i32
    %c0_i32_0 = arith.constant 0 : i32
    return %c0_i32, %arg0 : i32, i32
  }
  func.func @transform_1(%arg0: i32) -> (i32, i32) {
    %c0_i32 = arith.constant 0 : i32
    %c0_i32_0 = arith.constant 0 : i32
    %c0_i32_1 = arith.constant 0 : i32
    return %c0_i32, %c0_i32_0 : i32, i32
  }
  func.func @transform_2(%arg0: i32) -> (i32, i32) {
    %c0_i32 = arith.constant 0 : i32
    %c0_i32_0 = arith.constant 0 : i32
    %c0_i32_1 = arith.constant 0 : i32
    return %c0_i32, %c0_i32_0 : i32, i32
  }
  func.func @transform_3(%arg0: i32) -> (i32, i32, i32) {
    %c0_i32 = arith.constant 0 : i32
    %c0_i32_0 = arith.constant 0 : i32
    %c0_i32_1 = arith.constant 0 : i32
    %c0_i32_2 = arith.constant 0 : i32
    return %c0_i32, %c0_i32_0, %c0_i32_1 : i32, i32, i32
  }
  func.func @transform_4(%arg0: i32) -> (i32, i32, i32) {
    %c0_i32 = arith.constant 0 : i32
    %c0_i32_0 = arith.constant 0 : i32
    %c0_i32_1 = arith.constant 0 : i32
    %c0_i32_2 = arith.constant 0 : i32
    return %c0_i32, %c0_i32_0, %c0_i32_1 : i32, i32, i32
  }
  func.func @transform_5(%arg0: i32) -> (i32, i32, i32) {
    %c0_i32 = arith.constant 0 : i32
    %c0_i32_0 = arith.constant 0 : i32
    %c0_i32_1 = arith.constant 0 : i32
    %c0_i32_2 = arith.constant 0 : i32
    return %c0_i32, %c0_i32_0, %c0_i32_1 : i32, i32, i32
  }
  func.func @transform_6(%arg0: i32) -> (i32, i32) {
    %c0_i32 = arith.constant 0 : i32
    %c0_i32_0 = arith.constant 0 : i32
    %c0_i32_1 = arith.constant 0 : i32
    return %c0_i32, %c0_i32_0 : i32, i32
  }
  func.func @transform_7(%arg0: i32) -> (i32, i32) {
    %c0_i32 = arith.constant 0 : i32
    %c0_i32_0 = arith.constant 0 : i32
    %c0_i32_1 = arith.constant 0 : i32
    return %c0_i32, %c0_i32_0 : i32, i32
  }
  func.func @transform_8(%arg0: i32) -> (i32, i32) {
    %c0_i32 = arith.constant 0 : i32
    %c0_i32_0 = arith.constant 0 : i32
    %c0_i32_1 = arith.constant 0 : i32
    return %c0_i32, %c0_i32_0 : i32, i32
  }
  func.func @transform_9(%arg0: i32) -> (i32, i32) {
    %c0_i32 = arith.constant 0 : i32
    %c0_i32_0 = arith.constant 0 : i32
    return %c0_i32, %arg0 : i32, i32
  }
}

</mosaic_0001>

<bundles_post_ra>
// kernel: tpu_custom_call.1
= control target key start
LH: loop header
LB: loop body
LE: loop exit
PB: predicated region body
PF: predicated region fallthrough
CT: control target
= control target key end

     0   :  { %14 = vsyncpa [#allocation3], 0  ;;  %s3583_s0 = inlined_call_operand.vmem [shape: f32[2,512], index: 0, kind: input, shape index: {}]   ;;  %s3584_s1 = inlined_call_operand.vmem [shape: f32[32,2], index: 1, kind: input, shape index: {}]   ;;  %s3585_s2 = inlined_call_operand.vmem [shape: f32[32,1], index: 2, kind: input, shape index: {}]   ;;  %s3586_s3 = inlined_call_operand.vmem [shape: f32[3,32,32], index: 3, kind: input, shape index: {}]   ;;  %s3587_s4 = inlined_call_operand.hbm [shape: f32[3,32,32], index: 4, kind: input, shape index: {}]   ;;  %s3588_s5 = inlined_call_operand.vmem [shape: f32[3,32,1], index: 5, kind: input, shape index: {}]   ;;  %s3589_s6 = inlined_call_operand.vmem [shape: f32[3,32], index: 6, kind: input, shape index: {}]   ;;  %s3590_s7 = inlined_call_operand.vmem [shape: f32[3,32], index: 7, kind: input, shape index: {}]   ;;  %s3591_s8 = inlined_call_operand.vmem [shape: f32[3,1], index: 8, kind: input, shape index: {}]   ;;  %s3592_s9 = inlined_call_operand.hbm [shape: f32[3,512], index: 9, kind: output, shape index: {}]  }
   0x1   :  { %15 = vsyncpa [#allocation4], 0 }
   0x2   :  { %17 = vsyncpa [#allocation4 + $0x1], 0  ;;  %s2514_s30 = smov 0   ;;  %s2516_s10 = smov 0  }
   0x3   :  { %s2518_s11 = smov 0   ;;  %s2520_s12 = smov 0  }
   0x4 LB: > { %s2535_s13 = sadd.s32 4294967295, %s2455_s12   ;;  %s2180_s14 = sadd.s32 4294967294, %s2455_s12   ;;  %s2455_s12 = sphi %s2520_s12, %s3683_s12   ;;  %s2451_s11 = sphi %s2518_s11, %s3682_s11   ;;  %s2447_s10 = sphi %s2516_s10, %s3681_s10   ;;  %s2443_s30 = sphi %s2514_s30, %s3680_s30  }
   0x5   : > { %s2539_s15 = sadd.s32 1, %s2455_s12   ;;  %s224_s16 = sadd.s32 1, %s2451_s11 }
   0x6   : > { %s221_s17 = ssub.s32 %s2455_s12, %s2539_s15  ;;  %p234_p0 = scmp.ne.s32.totalorder %s2451_s11, %s2447_s10 }
   0x7   : > { %p222_p1 = scmp.eq.s32.totalorder %s221_s17, 0  ;;  %p235_p2 = scmp.eq.s32.totalorder %s2535_s13, 1 }
   0x8   : > { %p240_p3 = scmp.ne.s32.totalorder %s2447_s10, %s2443_s30  ;;  %p241_p4 = scmp.eq.s32.totalorder %s2180_s14, 1 }
   0x9   : > { %s2550_s18 = scalar_select %p222_p1, %s2451_s11, %s224_s16  }
   0xa   : > { %p2552_p5 = por %p235_p2, %p234_p0  ;;  %p2556_p6 = por %p241_p4, %p240_p3 }
   0xb   : > { %p2181_p7 = scmp.ge.s32.totalorder %s2455_s12, 1  ;;  %p248_p8 = scmp.lt.s32.totalorder %s2455_s12, 3 }
   0xc   : > { %s3595_s20 = scalar_select %p2556_p6, 1, 0 }
   0xd   : > { %p2258_p9 = scmp.eq.s32.totalorder %s2535_s13, 0  ;;  %p2563_p10 = pnand %p2181_p7, %p248_p8 }
   0xe   : > { %s2457_s22 = smov [#allocation2]  }
   0xf   : > { %s269_s23 = sshll.u32 %s2457_s22, 4  ;;  %p2250_p11 = pneg %p2563_p10  ;;  %s270_s23 = int_to_ptr.vmem [resolvable:$true] %s269_s23 }
  0x10   : > { %s2376_s24 = scalar_lea.vmem %s270_s23, 1536  ;;  %p2384_p3 = scmp.lt.s32.totalorder %s270_s23, %s270_s23 }
  0x11   : > { %p2251_p12 = pnand %p2258_p9, %p2250_p11  ;;  %p2377_p0 = scmp.ne.s32.totalorder %s270_s23, %s2376_s24 }
  0x12   : > { %p2385_p4 = scmp.lt.s32.totalorder %s2376_s24, %s2376_s24 }
  0x13   : > { %p2367_p13 = pneg %p2251_p12 }
  0x14   : > { %p2386_p6 = por %p2385_p4, %p2384_p3 }
  0x15   : > { %p2379_p1 = pnand %p2377_p0, %p2367_p13 }
  0x17   : > { %p2380_p2 = pneg %p2379_p1 }
  0x19   : > { %p2387_p7 = pnand %p2386_p6, %p2380_p2 }
  0x1b   : > { %2390 = shalt.err (!%p2387_p7)
}
  0x1c   : > { %s2458_s25 = smov 128   ;;  %s2459_s26 = smov 8  }
  0x1d   : > { %2253 = dma.hbm_to_vmem [thread:$0]  (!%p2251_p12), %s3587_s4, 1536, %s270_s23, [#allocation3], %s2458_s25, %s2458_s25, %s2459_s26  }
  0x1e   : > { %306 = sbr.rel (%p2563_p10) target bundleno = 1327 (0x52f), region = 56 }
  0x23   : > { %2434 = dma.done.wait (%p2258_p9), [#allocation3], 1536  }
  0x24   : > { %2436 = vsyncadd (%p2258_p9), [#allocation3], 4294965760  ;;  %s2187_s29 = sshll.u32 %s2535_s13, 1  ;;  %v2460_v0 = vmov 0.0   ;;  %v2461_v1 = vmov 0   ;;  %vm400_vm0 = vcmask 1041408  }
  0x25   : > { %p343_p8 = scmp.lt.s32.totalorder %s2187_s29, 3  ;;  %469 = vmatprep.mubr.f32.mxu0 %v2460_v0  ;;  %755 = vmatprep.mubr.f32.mxu1 %v2460_v0  ;;  %v357_v4 = vld [vmem:[%s3585_s2 + $0x18] sm:$0xff]  ;;  %v350_v5 = vld [vmem:[%s3584_s1] sm:$0xff]  ;;  %vm387_vm1 = vcmask 15360   ;;  %v355_v6 = vld [vmem:[%s3585_s2 + $0x8] sm:$0xff]  ;;  %s339_s17 = sand.u32 1, %s2447_s10  }
  0x26   : > { %2299 = vset.pattern.permute.xlu0 %v2461_v1  ;;  %2300 = vset.pattern.permute.xlu1 %v2461_v1  ;;  %v356_v7 = vld [vmem:[%s3585_s2 + $0x10] sm:$0xff]  ;;  %v354_v8 = vld [vmem:[%s3585_s2] sm:$0xff]  ;;  %v351_v9 = vld [vmem:[%s3584_s1 + $0x8] sm:$0xff]  ;;  %s2243_s22 = sshll.u32 %s2535_s13, 7  ;;  %s2095_s28 = scalar_lea.sflag [#allocation4], %s339_s17 }
  0x27   : > { %s3685_s29 = smov (!%p343_p8, %s2187_s29), 3  ;;  %375 = vperm.xlu0 %2299, %v357_v4   ;;  %365 = vperm.xlu1 %2300, %v355_v6   ;;  %v884_v10 = vld [vmem:[%s3588_s5 + $0x18] sm:$0xff]  ;;  %v883_v11 = vld [vmem:[%s3588_s5 + $0x10] sm:$0xff]  ;;  %v882_v13 = vld [vmem:[%s3588_s5 + $0x8] sm:$0xff]  ;;  %s2107_s27 = scalar_lea.hbm %s3592_s9, %s2243_s22 }
  0x28   : > { %s2188_s14 = sshll.u32 %s3685_s29, 1  ;;  %v352_v12 = vld [vmem:[%s3584_s1 + $0x10] sm:$0xff]  ;;  %v881_v14 = vld [vmem:[%s3588_s5] sm:$0xff]  ;;  %v353_v15 = vld [vmem:[%s3584_s1 + $0x18] sm:$0xff] }
  0x29   : > { %s346_s21 = scalar_lea.vmem %s3583_s0, %s2188_s14  ;;  %v2219_v16 = vld [vmem:[%s3588_s5 + $0x38] sm:$0xff]  ;;  %v2218_v17 = vld [vmem:[%s3588_s5 + $0x30] sm:$0xff]  ;;  %v2217_v18 = vld [vmem:[%s3588_s5 + $0x28] sm:$0xff]  ;;  %s2463_s14 = smov [#allocation5]  }
  0x2a   : > { %v2189_v2 = vld.sshfl [vmem:[%s346_s21] sm:$0x33 pattern:$0x76325410]  ;;  %v2235_v20 = vld [vmem:[%s3588_s5 + $0x58] sm:$0xff]  ;;  %v2234_v21 = vld [vmem:[%s3588_s5 + $0x50] sm:$0xff] }
  0x2b   : > { %v386_v3 = vcombine.high %v2189_v2, %v2189_v2  ;;  %370 = vperm.xlu0 %2299, %v356_v7   ;;  %360 = vperm.xlu1 %2300, %v354_v8   ;;  %v2216_v19 = vld [vmem:[%s3588_s5 + $0x20] sm:$0xff]  ;;  %v2233_v22 = vld [vmem:[%s3588_s5 + $0x48] sm:$0xff]  ;;  %s2186_s21 = sshll.u32 %s339_s17, 3  ;;  %s2395_s16 = sshll.u32 %s2463_s14, 4  ;;  %s2396_s16 = int_to_ptr.vmem [resolvable:$false] %s2395_s16 }
  0x2c   : > { %v2232_v23 = vld [vmem:[%s3588_s5 + $0x40] sm:$0xff]  ;;  %v663_v62 = vld [vmem:[%s3586_s3 + $0x8] sm:$0xff]  ;;  %s341_s23 = scalar_lea.vmem [#allocation5], %s2186_s21  ;;  %s2397_s13 = scalar_lea.vmem %s2396_s16, 256 }
  0x2d   : > { %2190 = vmatprep.subr.msk.mxu0 %vm400_vm0, %v386_v3  ;;  %v2081_v24 = vld [vmem:[%s3591_s8] sm:$0x7]  ;;  %s2109_s24 = sshll.u32 %s341_s23, 4  ;;  %s2110_s24 = int_to_ptr.vmem [resolvable:$true] %s2109_s24 }
  0x2e   : > { %2191 = vmatpush1.msk.msra.mxu0 %vm400_vm0, %v2189_v2  ;;  %v662_v7 = vld [vmem:[%s3586_s3] sm:$0xff]  ;;  %s2391_s29 = scalar_lea.vmem %s2110_s24, 128  ;;  %p2398_p11 = scmp.lt.s32.totalorder %s2110_s24, %s2396_s16 }
  0x2f   : > { %2192 = vmatmul.mubr.msk.f32.vlgmr.msra.gmra.mxu0 %vm387_vm1, %v350_v5  ;;  %902 = vperm.xlu0 %2299, %v884_v10   ;;  %p2392_p6 = scmp.ne.s32.totalorder %s2110_s24, %s2391_s29  ;;  %p2399_p12 = scmp.lt.s32.totalorder %s2397_s13, %s2391_s29 }
  0x30   : > { %475 = vmatprep.mubr.f32.mxu0 %v2460_v0  ;;  %897 = vperm.xlu1 %2300, %v883_v11  }
  0x31   : > { %p2393_p9 = pnand %p2392_p6, %p2552_p5  ;;  %p2400_p13 = por %p2399_p12, %p2398_p11 }
  0x33   : > { %2193 = vmatmul.mubr.msk.f32.gmra.mxu0 %vm387_vm1, %v351_v9  ;;  %892 = vperm.xlu0 %2299, %v882_v13   ;;  %p2394_p10 = pneg %p2393_p9 }
  0x34   : > { %481 = vmatprep.mubr.f32.mxu0 %v2460_v0  ;;  %887 = vperm.xlu1 %2300, %v881_v14  }
  0x35   : > { %p2401_p0 = pnand %p2400_p13, %p2394_p10 }
  0x37   : > { %2194 = vmatmul.mubr.msk.f32.gmra.mxu0 %vm387_vm1, %v352_v12  ;;  %1323 = vperm.xlu0 %2299, %v2219_v16  }
  0x38   : > { %487 = vmatprep.mubr.f32.mxu0 %v2460_v0  ;;  %1318 = vperm.xlu1 %2300, %v2218_v17  }
  0x3b   : > { %2195 = vmatmul.mubr.msk.f32.gmra.mxu0 %vm387_vm1, %v353_v15  ;;  %1313 = vperm.xlu0 %2299, %v2217_v18  }
  0x3c   : > { %856 = vmatprep.mubr.f32.mxu0 %v2460_v0  ;;  %1308 = vperm.xlu1 %2300, %v2216_v19  }
  0x3f   : > { %1744 = vperm.xlu0 %2299, %v2235_v20  }
  0x40   : > { %1739 = vperm.xlu1 %2300, %v2234_v21  }
  0x43   : > { %1734 = vperm.xlu0 %2299, %v2233_v22  }
  0x44   : > { %1729 = vperm.xlu1 %2300, %v2232_v23  }
  0x47   : > { %2084 = vperm.xlu0 %2299, %v2081_v24  }
  0xa2   : > { %v366_v25 = vpop.permute.xlu1 %365  ;;  %v376_v29 = vpop.permute.xlu0 %375 }
  0xa6   : > { %v361_v26 = vpop.permute.xlu1 %360  ;;  %v371_v36 = vpop.permute.xlu0 %370 }
  0xef   : > { %v471_v27 = vpop.f32.mrf.mxu0 }
  0xf0   : > { %v2657_v28 = vadd.f32 %v471_v27, %v361_v26 }
  0xf1   : > { %v473_v30 = vpop.f32.mrf.mxu0 }
  0xf2   : > { %2301 = vrcp.f32 %v2657_v28  ;;  %v2660_v31 = vadd.f32 %v473_v30, %v361_v26  ;;  %v494_v49 = vand.u32 2147483647, %v2657_v28  ;;  %vm630_vm11 = vcmp.lt.f32.partialorder %v2657_v28, 0.0 }
  0xf3   : > { %v477_v32 = vpop.f32.mrf.mxu0 }
  0xf4   : > { %2303 = vrcp.f32 %v2660_v31  ;;  %v2663_v33 = vadd.f32 %v477_v32, %v366_v25  ;;  %v495_v48 = vand.u32 2147483647, %v2660_v31  ;;  %vm2694_vm3 = vcmp.gt.f32.partialorder %v494_v49, 1.0 }
  0xf5   : > { %v479_v34 = vpop.f32.mrf.mxu0  ;;  %vm631_vm10 = vcmp.lt.f32.partialorder %v2660_v31, 0.0 }
  0xf6   : > { %2305 = vrcp.f32 %v2663_v33  ;;  %v2666_v35 = vadd.f32 %v479_v34, %v366_v25  ;;  %v496_v55 = vand.u32 2147483647, %v2663_v33  ;;  %vm2690_vm2 = vcmp.gt.f32.partialorder %v495_v48, 1.0 }
  0xf7   : > { %v483_v37 = vpop.f32.mrf.mxu0  ;;  %vm632_vm0 = vcmp.lt.f32.partialorder %v2663_v33, 0.0 }
  0xf8   : > { %2307 = vrcp.f32 %v2666_v35  ;;  %v2669_v38 = vadd.f32 %v483_v37, %v371_v36  ;;  %v497_v54 = vand.u32 2147483647, %v2666_v35  ;;  %vm2712_vm6 = vcmp.gt.f32.partialorder %v496_v55, 1.0 }
  0xf9   : > { %v485_v39 = vpop.f32.mrf.mxu0  ;;  %vm633_vm15 = vcmp.lt.f32.partialorder %v2666_v35, 0.0 }
  0xfa   : > { %2309 = vrcp.f32 %v2669_v38  ;;  %v2672_v40 = vadd.f32 %v485_v39, %v371_v36  ;;  %v498_v53 = vand.u32 2147483647, %v2669_v38  ;;  %vm2708_vm5 = vcmp.gt.f32.partialorder %v497_v54, 1.0 }
  0xfb   : > { %v489_v41 = vpop.f32.mrf.mxu0  ;;  %vm634_vm14 = vcmp.lt.f32.partialorder %v2669_v38, 0.0 }
  0xfc   : > { %2311 = vrcp.f32 %v2672_v40  ;;  %v2675_v42 = vadd.f32 %v489_v41, %v376_v29  ;;  %v499_v60 = vand.u32 2147483647, %v2672_v40  ;;  %vm2704_vm4 = vcmp.gt.f32.partialorder %v498_v53, 1.0 }
  0xfd   : > { %v491_v43 = vpop.f32.mrf.mxu0  ;;  %vm635_vm13 = vcmp.lt.f32.partialorder %v2672_v40, 0.0 }
  0xfe   : > { %2313 = vrcp.f32 %v2675_v42  ;;  %v2678_v44 = vadd.f32 %v491_v43, %v376_v29  ;;  %v500_v14 = vand.u32 2147483647, %v2675_v42  ;;  %vm2727_vm7 = vcmp.gt.f32.partialorder %v499_v60, 1.0 }
  0xff   : > { %v2302_v45 = vpop.eup %2301  ;;  %vm636_vm12 = vcmp.lt.f32.partialorder %v2675_v42, 0.0 }
 0x100   : > { %v518_v46 = vmul.f32 %v2302_v45, %v2657_v28  ;;  %2315 = vrcp.f32 %v2678_v44  ;;  %v501_v23 = vand.u32 2147483647, %v2678_v44  ;;  %vm2754_vm8 = vcmp.gt.f32.partialorder %v500_v14, 1.0 }
 0x101   : > { %v2304_v47 = vpop.eup %2303  ;;  %vm637_vm1 = vcmp.lt.f32.partialorder %v2678_v44, 0.0 }
 0x102   : > { %v526_v50 = vsub.f32 2.0, %v518_v46  ;;  %v519_v51 = vmul.f32 %v2304_v47, %v2660_v31  ;;  %vm2779_vm9 = vcmp.gt.f32.partialorder %v501_v23, 1.0 }
 0x103   : > { %v2306_v52 = vpop.eup %2305 }
 0x104   : > { %v520_v56 = vmul.f32 %v2306_v52, %v2663_v33  ;;  %v527_v57 = vsub.f32 2.0, %v519_v51  ;;  %v534_v58 = vmul.f32 %v2302_v45, %v526_v50 }
 0x105   : > { %v2308_v59 = vpop.eup %2307 }
 0x106   : > { %v528_v63 = vsub.f32 2.0, %v520_v56  ;;  %v521_v1 = vmul.f32 %v2308_v59, %v2666_v35  ;;  %v535_v2 = vmul.f32 %v2304_v47, %v527_v57  ;;  %v2702_v3 = vsel %vm2694_vm3, %v534_v58, %v2657_v28 }
 0x107   : > { %v2310_v4 = vpop.eup %2309  ;;  %v2718_v8 = vmul.f32 %v2702_v3, %v2702_v3 }
 0x108   : > { %v522_v9 = vmul.f32 %v2310_v4, %v2669_v38  ;;  %v529_v10 = vsub.f32 2.0, %v521_v1  ;;  %v536_v11 = vmul.f32 %v2306_v52, %v528_v63  ;;  %v2724_v12 = vsel %vm2690_vm2, %v535_v2, %v2660_v31 }
 0x109   : > { %v2312_v13 = vpop.eup %2311  ;;  %v2733_v16 = vmul.f32 %v2724_v12, %v2724_v12  ;;  %v558_v17 = vmul.f32 0.0208351, %v2718_v8 }
 0x10a   : > { %v530_v18 = vsub.f32 2.0, %v522_v9  ;;  %v523_v19 = vmul.f32 %v2312_v13, %v2672_v40  ;;  %v537_v20 = vmul.f32 %v2308_v59, %v529_v10  ;;  %v2740_v21 = vsel %vm2712_vm6, %v536_v11, %v2663_v33 }
 0x10b   : > { %v2314_v22 = vpop.eup %2313  ;;  %v2745_v24 = vmul.f32 %v2740_v21, %v2740_v21  ;;  %v559_v25 = vmul.f32 0.0208351, %v2733_v16  ;;  %v566_v26 = vadd.f32 -0.085133, %v558_v17 }
 0x10c   : > { %v524_v27 = vmul.f32 %v2314_v22, %v2675_v42  ;;  %v531_v29 = vsub.f32 2.0, %v523_v19  ;;  %v538_v30 = vmul.f32 %v2310_v4, %v530_v18  ;;  %v2752_v32 = vsel %vm2708_vm5, %v537_v20, %v2666_v35 }
 0x10d   : > { %v2316_v34 = vpop.eup %2315  ;;  %v553_v37 = vmul.f32 %v2752_v32, %v2752_v32  ;;  %v560_v39 = vmul.f32 0.0208351, %v2745_v24  ;;  %v567_v41 = vadd.f32 -0.085133, %v559_v25  ;;  %v574_v55 = vmul.f32 %v566_v26, %v2718_v8 }
 0x10e   : > { %v532_v43 = vsub.f32 2.0, %v524_v27  ;;  %v525_v45 = vmul.f32 %v2316_v34, %v2678_v44  ;;  %v539_v46 = vmul.f32 %v2312_v13, %v531_v29  ;;  %v2765_v47 = vsel %vm2704_vm4, %v538_v30, %v2669_v38 }
 0x10f   : > { %v554_v48 = vmul.f32 %v2765_v47, %v2765_v47  ;;  %v561_v49 = vmul.f32 0.0208351, %v553_v37  ;;  %v568_v50 = vadd.f32 -0.085133, %v560_v39  ;;  %v575_v51 = vmul.f32 %v567_v41, %v2733_v16 }
 0x110   : > { %v533_v52 = vsub.f32 2.0, %v525_v45  ;;  %v540_v53 = vmul.f32 %v2314_v22, %v532_v43  ;;  %v2773_v54 = vsel %vm2727_vm7, %v539_v46, %v2672_v40  ;;  %v582_v17 = vadd.f32 0.180141, %v574_v55 }
 0x111   : > { %v555_v56 = vmul.f32 %v2773_v54, %v2773_v54  ;;  %v562_v57 = vmul.f32 0.0208351, %v554_v48  ;;  %v569_v58 = vadd.f32 -0.085133, %v561_v49  ;;  %v576_v59 = vmul.f32 %v568_v50, %v2745_v24 }
 0x112   : > { %v541_v63 = vmul.f32 %v2316_v34, %v533_v52  ;;  %v2786_v1 = vsel %vm2754_vm8, %v540_v53, %v2675_v42  ;;  %v583_v2 = vadd.f32 0.180141, %v575_v51  ;;  %v590_v41 = vmul.f32 %v582_v17, %v2718_v8 }
 0x113   : > { %v556_v4 = vmul.f32 %v2786_v1, %v2786_v1  ;;  %v563_v9 = vmul.f32 0.0208351, %v555_v56  ;;  %v570_v10 = vadd.f32 -0.085133, %v562_v57  ;;  %v577_v11 = vmul.f32 %v569_v58, %v553_v37 }
 0x114   : > { %v2793_v13 = vsel %vm2779_vm9, %v541_v63, %v2678_v44  ;;  %v584_v14 = vadd.f32 0.180141, %v576_v59  ;;  %v591_v26 = vmul.f32 %v583_v2, %v2733_v16  ;;  %v598_v63 = vadd.f32 -0.3302995, %v590_v41 }
 0x115   : > { %v557_v18 = vmul.f32 %v2793_v13, %v2793_v13  ;;  %v564_v19 = vmul.f32 0.0208351, %v556_v4  ;;  %v571_v20 = vadd.f32 -0.085133, %v563_v9  ;;  %v578_v22 = vmul.f32 %v570_v10, %v554_v48 }
 0x116   : > { %v585_v23 = vadd.f32 0.180141, %v577_v11  ;;  %v592_v25 = vmul.f32 %v584_v14, %v2745_v24  ;;  %v599_v52 = vadd.f32 -0.3302995, %v591_v26 }
 0x117   : > { %v565_v27 = vmul.f32 0.0208351, %v557_v18  ;;  %v572_v29 = vadd.f32 -0.085133, %v564_v19  ;;  %v579_v30 = vmul.f32 %v571_v20, %v555_v56  ;;  %v586_v34 = vadd.f32 0.180141, %v578_v22 }
 0x118   : > { %v593_v39 = vmul.f32 %v585_v23, %v553_v37  ;;  %v600_v51 = vadd.f32 -0.3302995, %v592_v25  ;;  %v607_v22 = vmul.f32 %v599_v52, %v2733_v16  ;;  %v606_v25 = vmul.f32 %v598_v63, %v2718_v8 }
 0x119   : > { %v573_v43 = vadd.f32 -0.085133, %v565_v27  ;;  %v580_v45 = vmul.f32 %v572_v29, %v556_v4  ;;  %v587_v46 = vadd.f32 0.180141, %v579_v30  ;;  %v594_v49 = vmul.f32 %v586_v34, %v554_v48 }
 0x11a   : > { %v601_v50 = vadd.f32 -0.3302995, %v593_v39  ;;  %v608_v14 = vmul.f32 %v600_v51, %v2745_v24  ;;  %v615_v30 = vadd.f32 0.999866, %v607_v22 }
 0x11b   : > { %v581_v53 = vmul.f32 %v573_v43, %v557_v18  ;;  %v588_v55 = vadd.f32 0.180141, %v580_v45  ;;  %v595_v57 = vmul.f32 %v587_v46, %v555_v56  ;;  %v602_v58 = vadd.f32 -0.3302995, %v594_v49 }
 0x11c   : > { %v609_v59 = vmul.f32 %v601_v50, %v553_v37  ;;  %v616_v24 = vadd.f32 0.999866, %v608_v14  ;;  %v2462_v43 = vmov 1.5707964   ;;  %v668_v14 = vld [vmem:[#allocation2 + $0x10] sm:$0xff] }
 0x11d   : > { %v589_v2 = vadd.f32 0.180141, %v581_v53  ;;  %v596_v9 = vmul.f32 %v588_v55, %v556_v4  ;;  %v603_v10 = vadd.f32 -0.3302995, %v595_v57  ;;  %v610_v11 = vmul.f32 %v602_v58, %v554_v48 }
 0x11e   : > { %v617_v29 = vadd.f32 0.999866, %v609_v59  ;;  %v624_v45 = vmul.f32 %v616_v24, %v2740_v21  ;;  %v645_v49 = vsel %vm637_vm1, -1.5707964, %v2462_v43  ;;  %v641_v40 = vsel %vm633_vm15, -1.5707964, %v2462_v43 }
 0x11f   : > { %v597_v17 = vmul.f32 %v589_v2, %v557_v18  ;;  %v604_v19 = vadd.f32 -0.3302995, %v596_v9  ;;  %v611_v20 = vmul.f32 %v603_v10, %v555_v56  ;;  %v618_v23 = vadd.f32 0.999866, %v610_v11  ;;  %v666_v9 = vld [vmem:[#allocation2] sm:$0xff]  ;;  %v667_v10 = vld [vmem:[#allocation2 + $0x8] sm:$0xff] }
 0x120   : > { %v625_v41 = vmul.f32 %v617_v29, %v2752_v32  ;;  %v623_v32 = vmul.f32 %v615_v30, %v2724_v12  ;;  %v640_v21 = vsel %vm632_vm0, -1.5707964, %v2462_v43  ;;  %v639_v12 = vsel %vm631_vm10, -1.5707964, %v2462_v43  ;;  %v664_v11 = vld [vmem:[%s3586_s3 + $0x10] sm:$0xff] }
 0x121   : > { %v605_v37 = vadd.f32 -0.3302995, %v597_v17  ;;  %v612_v26 = vmul.f32 %v604_v19, %v556_v4  ;;  %v619_v27 = vadd.f32 0.999866, %v611_v20  ;;  %v626_v8 = vmul.f32 %v618_v23, %v2765_v47  ;;  %v665_v17 = vld [vmem:[%s3586_s3 + $0x18] sm:$0xff]  ;;  %v898_v20 = vpop.permute.xlu1 %897  ;;  %v903_v23 = vpop.permute.xlu0 %902 }
 0x122   : > { %v614_v4 = vadd.f32 0.999866, %v606_v25  ;;  %v643_v47 = vsel %vm635_vm13, -1.5707964, %v2462_v43  ;;  %v649_v38 = vsub.f32 %v641_v40, %v625_v41  ;;  %v648_v52 = vsub.f32 %v640_v21, %v624_v45  ;;  %v669_v19 = vld [vmem:[#allocation2 + $0x18] sm:$0xff] }
 0x123   : > { %v613_v48 = vmul.f32 %v605_v37, %v557_v18  ;;  %v620_v16 = vadd.f32 0.999866, %v612_v26  ;;  %v627_v56 = vmul.f32 %v619_v27, %v2773_v54  ;;  %v644_v54 = vsel %vm636_vm12, -1.5707964, %v2462_v43 }
 0x124   : > { %v642_v18 = vsel %vm634_vm14, -1.5707964, %v2462_v43  ;;  %v622_v50 = vmul.f32 %v614_v4, %v2702_v3  ;;  %v647_v53 = vsub.f32 %v639_v12, %v623_v32  ;;  %v638_v33 = vsel %vm630_vm11, -1.5707964, %v2462_v43 }
 0x125   : > { %v621_v34 = vadd.f32 0.999866, %v613_v48  ;;  %v628_v39 = vmul.f32 %v620_v16, %v2786_v1  ;;  %v651_v46 = vsub.f32 %v643_v47, %v627_v56  ;;  %v650_v42 = vsub.f32 %v642_v18, %v626_v8  ;;  %v888_v26 = vpop.permute.xlu1 %887 }
 0x126   : > { %v646_v57 = vsub.f32 %v638_v33, %v622_v50  ;;  %v657_v60 = vsel %vm2708_vm5, %v649_v38, %v625_v41  ;;  %v656_v15 = vsel %vm2712_vm6, %v648_v52, %v624_v45  ;;  %v655_v59 = vsel %vm2690_vm2, %v647_v53, %v623_v32 }
 0x127   : > { %v629_v44 = vmul.f32 %v621_v34, %v2793_v13  ;;  %v652_v1 = vsub.f32 %v644_v54, %v628_v39  ;;  %v659_v3 = vsel %vm2727_vm7, %v651_v46, %v627_v56  ;;  %v658_v36 = vsel %vm2704_vm4, %v650_v42, %v626_v8  ;;  %v893_v8 = vpop.permute.xlu0 %892 }
 0x128   : > { %v675_v58 = vmul.f32 %v659_v3, %v659_v3  ;;  %v674_v28 = vmul.f32 %v658_v36, %v658_v36  ;;  %v673_v5 = vmul.f32 %v657_v60, %v657_v60  ;;  %v654_v63 = vsel %vm2694_vm3, %v646_v57, %v622_v50 }
 0x129   : > { %v653_v51 = vsub.f32 %v645_v49, %v629_v44  ;;  %v660_v13 = vsel %vm2754_vm8, %v652_v1, %v628_v39  ;;  %v672_v6 = vmul.f32 %v656_v15, %v656_v15  ;;  %vm3593_vm4 = vcmask 261120  }
 0x12a   : > { %v676_v31 = vmul.f32 %v660_v13, %v660_v13  ;;  %v671_v2 = vmul.f32 %v655_v59, %v655_v59  ;;  %v670_v61 = vmul.f32 %v654_v63, %v654_v63 }
 0x12b   : > { %v661_v35 = vsel %vm2779_vm9, %v653_v51, %v629_v44 }
 0x12c   : > { %816 = vmatprep.subr.mxu0 %v661_v35  ;;  %v677_v55 = vmul.f32 %v661_v35, %v661_v35 }
 0x12d   : > { %817 = vmatpush1.msra.mxu0 %v660_v13 }
 0x12e   : > { %715 = vmatprep.subr.mxu1 %v677_v55  ;;  %818 = vmatprep.subr.mxu0 %v659_v3 }
 0x12f   : > { %716 = vmatpush1.msra.mxu1 %v676_v31  ;;  %819 = vmatpush1.msra.mxu0 %v658_v36 }
 0x130   : > { %717 = vmatprep.subr.mxu1 %v675_v58  ;;  %820 = vmatprep.subr.mxu0 %v657_v60 }
 0x131   : > { %718 = vmatpush1.msra.mxu1 %v674_v28  ;;  %821 = vmatpush1.msra.mxu0 %v656_v15 }
 0x132   : > { %719 = vmatprep.subr.mxu1 %v673_v5  ;;  %822 = vmatprep.subr.mxu0 %v655_v59 }
 0x133   : > { %720 = vmatpush1.msra.mxu1 %v672_v6  ;;  %823 = vmatpush1.msra.mxu0 %v654_v63  ;;  %v1087_v6 = vld [vmem:[#allocation2 + $0x20] sm:$0xff] }
 0x134   : > { %721 = vmatprep.subr.mxu1 %v671_v2  ;;  %2200 = vmatmul.mubr.msk.f32.vlgmr.msra.gmra.mxu0 %vm3593_vm4, %v662_v7  ;;  %v2205_v7 = vld [vmem:[%s3586_s3 + $0x28] sm:$0xff] }
 0x135   : > { %722 = vmatpush1.msra.mxu1 %v670_v61  ;;  %862 = vmatprep.mubr.f32.mxu0 %v2460_v0 }
 0x136   : > { %2196 = vmatmul.mubr.msk.f32.vlgmr.msra.gmra.mxu1 %vm3593_vm4, %v666_v9  ;;  %v2204_v9 = vld [vmem:[%s3586_s3 + $0x20] sm:$0xff] }
 0x137   : > { %761 = vmatprep.mubr.f32.mxu1 %v2460_v0 }
 0x138   : > { %2201 = vmatmul.mubr.msk.f32.gmra.mxu0 %vm3593_vm4, %v663_v62 }
 0x139   : > { %868 = vmatprep.mubr.f32.mxu0 %v2460_v0 }
 0x13a   : > { %2197 = vmatmul.mubr.msk.f32.gmra.mxu1 %vm3593_vm4, %v667_v10 }
 0x13b   : > { %767 = vmatprep.mubr.f32.mxu1 %v2460_v0 }
 0x13c   : > { %2202 = vmatmul.mubr.msk.f32.gmra.mxu0 %vm3593_vm4, %v664_v11 }
 0x13d   : > { %874 = vmatprep.mubr.f32.mxu0 %v2460_v0 }
 0x13e   : > { %2198 = vmatmul.mubr.msk.f32.gmra.mxu1 %vm3593_vm4, %v668_v14 }
 0x13f   : > { %773 = vmatprep.mubr.f32.mxu1 %v2460_v0 }
 0x140   : > { %2203 = vmatmul.mubr.msk.f32.gmra.mxu0 %vm3593_vm4, %v665_v17 }
 0x141   : > { %1276 = vmatprep.mubr.f32.mxu0 %v2460_v0 }
 0x142   : > { %2199 = vmatmul.mubr.msk.f32.gmra.mxu1 %vm3593_vm4, %v669_v19 }
 0x143   : > { %1175 = vmatprep.mubr.f32.mxu1 %v2460_v0 }
 0x1f4   : > { %v858_v22 = vpop.f32.mrf.mxu0 }
 0x1f6   : > { %v757_v25 = vpop.f32.mrf.mxu1  ;;  %v860_v37 = vpop.f32.mrf.mxu0 }
 0x1f7   : > { %v859_v27 = vadd.f32 %v858_v22, %v757_v25 }
 0x1f8   : > { %v759_v29 = vpop.f32.mrf.mxu1  ;;  %v864_v24 = vpop.f32.mrf.mxu0 }
 0x1f9   : > { %v2885_v48 = vadd.f32 %v888_v26, %v859_v27  ;;  %v861_v16 = vadd.f32 %v860_v37, %v759_v29 }
 0x1fa   : > { %v763_v56 = vpop.f32.mrf.mxu1  ;;  %v866_v30 = vpop.f32.mrf.mxu0 }
 0x1fb   : > { %2317 = vrcp.f32 %v2885_v48  ;;  %v2888_v4 = vadd.f32 %v888_v26, %v861_v16  ;;  %v865_v34 = vadd.f32 %v864_v24, %v763_v56  ;;  %v913_v33 = vand.u32 2147483647, %v2885_v48 }
 0x1fc   : > { %v765_v39 = vpop.f32.mrf.mxu1  ;;  %v870_v41 = vpop.f32.mrf.mxu0  ;;  %vm1049_vm12 = vcmp.lt.f32.partialorder %v2885_v48, 0.0 }
 0x1fd   : > { %2319 = vrcp.f32 %v2888_v4  ;;  %v2891_v54 = vadd.f32 %v893_v8, %v865_v34  ;;  %v867_v47 = vadd.f32 %v866_v30, %v765_v39  ;;  %v914_v53 = vand.u32 2147483647, %v2888_v4 }
 0x1fe   : > { %v769_v18 = vpop.f32.mrf.mxu1  ;;  %v872_v45 = vpop.f32.mrf.mxu0  ;;  %vm2922_vm3 = vcmp.gt.f32.partialorder %v913_v33, 1.0  ;;  %vm1050_vm11 = vcmp.lt.f32.partialorder %v2888_v4, 0.0 }
 0x1ff   : > { %2321 = vrcp.f32 %v2891_v54  ;;  %v2894_v44 = vadd.f32 %v893_v8, %v867_v47  ;;  %v871_v1 = vadd.f32 %v870_v41, %v769_v18  ;;  %v915_v36 = vand.u32 2147483647, %v2891_v54 }
 0x200   : > { %v771_v46 = vpop.f32.mrf.mxu1  ;;  %v876_v32 = vpop.f32.mrf.mxu0  ;;  %vm2918_vm2 = vcmp.gt.f32.partialorder %v914_v53, 1.0  ;;  %vm1051_vm1 = vcmp.lt.f32.partialorder %v2891_v54, 0.0 }
 0x201   : > { %2323 = vrcp.f32 %v2894_v44  ;;  %v2897_v49 = vadd.f32 %v898_v20, %v871_v1  ;;  %v873_v42 = vadd.f32 %v872_v45, %v771_v46  ;;  %v916_v58 = vand.u32 2147483647, %v2894_v44 }
 0x202   : > { %v775_v40 = vpop.f32.mrf.mxu1  ;;  %v878_v38 = vpop.f32.mrf.mxu0  ;;  %vm2927_vm5 = vcmp.gt.f32.partialorder %v915_v36, 1.0  ;;  %vm1052_vm0 = vcmp.lt.f32.partialorder %v2894_v44, 0.0 }
 0x203   : > { %2325 = vrcp.f32 %v2897_v49  ;;  %v2900_v50 = vadd.f32 %v898_v20, %v873_v42  ;;  %v877_v51 = vadd.f32 %v876_v32, %v775_v40  ;;  %v917_v60 = vand.u32 2147483647, %v2897_v49 }
 0x204   : > { %v777_v21 = vpop.f32.mrf.mxu1  ;;  %vm2936_vm7 = vcmp.gt.f32.partialorder %v916_v58, 1.0  ;;  %vm1053_vm15 = vcmp.lt.f32.partialorder %v2897_v49, 0.0 }
 0x205   : > { %2327 = vrcp.f32 %v2900_v50  ;;  %v2903_v13 = vadd.f32 %v903_v23, %v877_v51  ;;  %v879_v52 = vadd.f32 %v878_v38, %v777_v21  ;;  %v918_v63 = vand.u32 2147483647, %v2900_v50 }
 0x206   : > { %vm2932_vm6 = vcmp.gt.f32.partialorder %v917_v60, 1.0  ;;  %vm1054_vm14 = vcmp.lt.f32.partialorder %v2900_v50, 0.0 }
 0x207   : > { %2329 = vrcp.f32 %v2903_v13  ;;  %v2906_v12 = vadd.f32 %v903_v23, %v879_v52  ;;  %v919_v14 = vand.u32 2147483647, %v2903_v13  ;;  %vm2952_vm8 = vcmp.gt.f32.partialorder %v918_v63, 1.0 }
 0x208   : > { %v2318_v35 = vpop.eup %2317  ;;  %vm1055_vm13 = vcmp.lt.f32.partialorder %v2903_v13, 0.0 }
 0x209   : > { %2331 = vrcp.f32 %v2906_v12  ;;  %v937_v55 = vmul.f32 %v2318_v35, %v2885_v48  ;;  %v920_v27 = vand.u32 2147483647, %v2906_v12  ;;  %vm2970_vm9 = vcmp.gt.f32.partialorder %v919_v14, 1.0 }
 0x20a   : > { %v2320_v3 = vpop.eup %2319  ;;  %vm1056_vm4 = vcmp.lt.f32.partialorder %v2906_v12, 0.0 }
 0x20b   : > { %v938_v57 = vmul.f32 %v2320_v3, %v2888_v4  ;;  %v945_v15 = vsub.f32 2.0, %v937_v55  ;;  %vm3007_vm10 = vcmp.gt.f32.partialorder %v920_v27, 1.0 }
 0x20c   : > { %v2322_v31 = vpop.eup %2321 }
 0x20d   : > { %v939_v28 = vmul.f32 %v2322_v31, %v2891_v54  ;;  %v946_v59 = vsub.f32 2.0, %v938_v57  ;;  %v953_v2 = vmul.f32 %v2318_v35, %v945_v15 }
 0x20e   : > { %v2324_v5 = vpop.eup %2323 }
 0x20f   : > { %v940_v61 = vmul.f32 %v2324_v5, %v2894_v44  ;;  %v947_v62 = vsub.f32 2.0, %v939_v28  ;;  %v954_v10 = vmul.f32 %v2320_v3, %v946_v59  ;;  %v2943_v20 = vsel %vm2922_vm3, %v953_v2, %v2885_v48 }
 0x210   : > { %v2326_v11 = vpop.eup %2325  ;;  %v2962_v16 = vmul.f32 %v2943_v20, %v2943_v20 }
 0x211   : > { %v941_v22 = vmul.f32 %v2326_v11, %v2897_v49  ;;  %v948_v23 = vsub.f32 2.0, %v940_v61  ;;  %v955_v25 = vmul.f32 %v2322_v31, %v947_v62  ;;  %v2949_v37 = vsel %vm2918_vm2, %v954_v10, %v2888_v4 }
 0x212   : > { %v2328_v26 = vpop.eup %2327  ;;  %v2958_v24 = vmul.f32 %v2949_v37, %v2949_v37  ;;  %v977_v45 = vmul.f32 0.0208351, %v2962_v16 }
 0x213   : > { %v942_v56 = vmul.f32 %v2328_v26, %v2900_v50  ;;  %v949_v30 = vsub.f32 2.0, %v941_v22  ;;  %v956_v8 = vmul.f32 %v2324_v5, %v948_v23  ;;  %v2968_v34 = vsel %vm2927_vm5, %v955_v25, %v2891_v54 }
 0x214   : > { %v2330_v39 = vpop.eup %2329  ;;  %v2976_v47 = vmul.f32 %v2968_v34, %v2968_v34  ;;  %v978_v18 = vmul.f32 0.0208351, %v2958_v24  ;;  %v985_v52 = vadd.f32 -0.085133, %v977_v45  ;;  %v1057_v54 = vsel %vm1049_vm12, -1.5707964, %v2462_v43 }
 0x215   : > { %v943_v1 = vmul.f32 %v2330_v39, %v2903_v13  ;;  %v950_v46 = vsub.f32 2.0, %v942_v56  ;;  %v957_v32 = vmul.f32 %v2326_v11, %v949_v30  ;;  %v2984_v42 = vsel %vm2936_vm7, %v956_v8, %v2894_v44 }
 0x216   : > { %v2332_v40 = vpop.eup %2331  ;;  %v972_v51 = vmul.f32 %v2984_v42, %v2984_v42  ;;  %v979_v38 = vmul.f32 0.0208351, %v2976_v47  ;;  %v986_v21 = vadd.f32 -0.085133, %v978_v18  ;;  %v993_v28 = vmul.f32 %v985_v52, %v2962_v16 }
 0x217   : > { %v944_v35 = vmul.f32 %v2332_v40, %v2906_v12  ;;  %v951_v3 = vsub.f32 2.0, %v943_v1  ;;  %v958_v53 = vmul.f32 %v2328_v26, %v950_v46  ;;  %v2993_v33 = vsel %vm2932_vm6, %v957_v32, %v2897_v49 }
 0x218   : > { %v973_v55 = vmul.f32 %v2993_v33, %v2993_v33  ;;  %v980_v36 = vmul.f32 0.0208351, %v972_v51  ;;  %v987_v57 = vadd.f32 -0.085133, %v979_v38  ;;  %v994_v31 = vmul.f32 %v986_v21, %v2958_v24 }
 0x219   : > { %v952_v60 = vsub.f32 2.0, %v944_v35  ;;  %v959_v58 = vmul.f32 %v2330_v39, %v951_v3  ;;  %v3001_v15 = vsel %vm2952_vm8, %v958_v53, %v2900_v50  ;;  %v1001_v56 = vadd.f32 0.180141, %v993_v28 }
 0x21a   : > { %v974_v59 = vmul.f32 %v3001_v15, %v3001_v15  ;;  %v981_v5 = vmul.f32 0.0208351, %v973_v55  ;;  %v988_v63 = vadd.f32 -0.085133, %v980_v36  ;;  %v995_v2 = vmul.f32 %v987_v57, %v2976_v47 }
 0x21b   : > { %v960_v62 = vmul.f32 %v2332_v40, %v952_v60  ;;  %v3014_v10 = vsel %vm2970_vm9, %v959_v58, %v2903_v13  ;;  %v1002_v11 = vadd.f32 0.180141, %v994_v31  ;;  %v1009_v35 = vmul.f32 %v1001_v56, %v2962_v16 }
 0x21c   : > { %v975_v14 = vmul.f32 %v3014_v10, %v3014_v10  ;;  %v982_v22 = vmul.f32 0.0208351, %v974_v59  ;;  %v989_v23 = vadd.f32 -0.085133, %v981_v5  ;;  %v996_v25 = vmul.f32 %v988_v63, %v972_v51 }
 0x21d   : > { %v3021_v26 = vsel %vm3007_vm10, %v960_v62, %v2906_v12  ;;  %v1003_v27 = vadd.f32 0.180141, %v995_v2  ;;  %v1010_v46 = vmul.f32 %v1002_v11, %v2958_v24  ;;  %v1017_v11 = vadd.f32 -0.3302995, %v1009_v35 }
 0x21e   : > { %v976_v30 = vmul.f32 %v3021_v26, %v3021_v26  ;;  %v983_v8 = vmul.f32 0.0208351, %v975_v14  ;;  %v990_v39 = vadd.f32 -0.085133, %v982_v22  ;;  %v997_v18 = vmul.f32 %v989_v23, %v973_v55 }
 0x21f   : > { %v1004_v45 = vadd.f32 0.180141, %v996_v25  ;;  %v1011_v1 = vmul.f32 %v1003_v27, %v2976_v47  ;;  %v1018_v58 = vadd.f32 -0.3302995, %v1010_v46  ;;  %v1060_v50 = vsel %vm1052_vm0, -1.5707964, %v2462_v43 }
 0x220   : > { %v984_v32 = vmul.f32 0.0208351, %v976_v30  ;;  %v991_v40 = vadd.f32 -0.085133, %v983_v8  ;;  %v998_v38 = vmul.f32 %v990_v39, %v974_v59  ;;  %v1005_v21 = vadd.f32 0.180141, %v997_v18 }
 0x221   : > { %v1012_v52 = vmul.f32 %v1004_v45, %v972_v51  ;;  %v1019_v60 = vadd.f32 -0.3302995, %v1011_v1  ;;  %v1026_v45 = vmul.f32 %v1018_v58, %v2958_v24  ;;  %v1025_v1 = vmul.f32 %v1017_v11, %v2962_v16 }
 0x222   : > { %v992_v3 = vadd.f32 -0.085133, %v984_v32  ;;  %v999_v53 = vmul.f32 %v991_v40, %v975_v14  ;;  %v1006_v36 = vadd.f32 0.180141, %v998_v38  ;;  %v1013_v57 = vmul.f32 %v1005_v21, %v973_v55 }
 0x223   : > { %v1020_v31 = vadd.f32 -0.3302995, %v1012_v52  ;;  %v1027_v8 = vmul.f32 %v1019_v60, %v2976_v47  ;;  %v1034_v21 = vadd.f32 0.999866, %v1026_v45 }
 0x224   : > { %v1000_v28 = vmul.f32 %v992_v3, %v976_v30  ;;  %v1007_v5 = vadd.f32 0.180141, %v999_v53  ;;  %v1014_v63 = vmul.f32 %v1006_v36, %v974_v59  ;;  %v1021_v2 = vadd.f32 -0.3302995, %v1013_v57 }
 0x225   : > { %v1028_v62 = vmul.f32 %v1020_v31, %v972_v51  ;;  %v1035_v47 = vadd.f32 0.999866, %v1027_v8  ;;  %v1064_v57 = vsel %vm1056_vm4, -1.5707964, %v2462_v43  ;;  %vm3629_vm4 = vcmask 261120   ;;  %v1089_v8 = vld [vmem:[#allocation2 + $0x30] sm:$0xff] }
 0x226   : > { %v1008_v22 = vadd.f32 0.180141, %v1000_v28  ;;  %v1015_v23 = vmul.f32 %v1007_v5, %v975_v14  ;;  %v1022_v25 = vadd.f32 -0.3302995, %v1014_v63  ;;  %v1029_v27 = vmul.f32 %v1021_v2, %v973_v55 }
 0x227   : > { %v1036_v38 = vadd.f32 0.999866, %v1028_v62  ;;  %v1043_v53 = vmul.f32 %v1035_v47, %v2968_v34  ;;  %v1059_v34 = vsel %vm1051_vm1, -1.5707964, %v2462_v43 }
 0x228   : > { %v1016_v56 = vmul.f32 %v1008_v22, %v976_v30  ;;  %v1023_v39 = vadd.f32 -0.3302995, %v1015_v23  ;;  %v1030_v18 = vmul.f32 %v1022_v25, %v974_v59  ;;  %v1037_v32 = vadd.f32 0.999866, %v1029_v27  ;;  %v1088_v25 = vld [vmem:[#allocation2 + $0x28] sm:$0xff]  ;;  %v2206_v27 = vld [vmem:[%s3586_s3 + $0x30] sm:$0xff] }
 0x229   : > { %v1044_v3 = vmul.f32 %v1036_v38, %v2984_v42  ;;  %v1042_v42 = vmul.f32 %v1034_v21, %v2949_v37  ;;  %v1067_v58 = vsub.f32 %v1059_v34, %v1043_v53  ;;  %v1058_v37 = vsel %vm1050_vm11, -1.5707964, %v2462_v43 }
 0x22a   : > { %v1024_v51 = vadd.f32 -0.3302995, %v1016_v56  ;;  %v1031_v46 = vmul.f32 %v1023_v39, %v975_v14  ;;  %v1038_v40 = vadd.f32 0.999866, %v1030_v18  ;;  %v1045_v16 = vmul.f32 %v1037_v32, %v2993_v33  ;;  %v2207_v56 = vld [vmem:[%s3586_s3 + $0x38] sm:$0xff]  ;;  %v1319_v18 = vpop.permute.xlu1 %1318  ;;  %v1324_v32 = vpop.permute.xlu0 %1323 }
 0x22b   : > { %v1033_v14 = vadd.f32 0.999866, %v1025_v1  ;;  %v1062_v33 = vsel %vm1054_vm14, -1.5707964, %v2462_v43  ;;  %v1068_v49 = vsub.f32 %v1060_v50, %v1044_v3  ;;  %v1066_v28 = vsub.f32 %v1058_v37, %v1042_v42  ;;  %v1090_v39 = vld [vmem:[#allocation2 + $0x38] sm:$0xff] }
 0x22c   : > { %v1032_v55 = vmul.f32 %v1024_v51, %v976_v30  ;;  %v1039_v24 = vadd.f32 0.999866, %v1031_v46  ;;  %v1046_v59 = vmul.f32 %v1038_v40, %v3001_v15  ;;  %v1063_v30 = vsel %vm1055_vm13, -1.5707964, %v2462_v43 }
 0x22d   : > { %v1061_v15 = vsel %vm1053_vm15, -1.5707964, %v2462_v43  ;;  %v1041_v31 = vmul.f32 %v1033_v14, %v2943_v20  ;;  %v1076_v4 = vsel %vm2936_vm7, %v1068_v49, %v1044_v3  ;;  %v1075_v29 = vsel %vm2927_vm5, %v1067_v58, %v1043_v53 }
 0x22e   : > { %v1040_v52 = vadd.f32 0.999866, %v1032_v55  ;;  %v1047_v35 = vmul.f32 %v1039_v24, %v3014_v10  ;;  %v1070_v10 = vsub.f32 %v1062_v33, %v1046_v59  ;;  %v1069_v13 = vsub.f32 %v1061_v15, %v1045_v16  ;;  %v1309_v46 = vpop.permute.xlu1 %1308 }
 0x22f   : > { %v1065_v63 = vsub.f32 %v1057_v54, %v1041_v31  ;;  %v1074_v62 = vsel %vm2918_vm2, %v1066_v28, %v1042_v42  ;;  %v1094_v17 = vmul.f32 %v1076_v4, %v1076_v4  ;;  %v1093_v19 = vmul.f32 %v1075_v29, %v1075_v29  ;;  %vm3630_vm2 = vmmov %vm3629_vm4 }
 0x230   : > { %v1048_v12 = vmul.f32 %v1040_v52, %v3021_v26  ;;  %v1071_v36 = vsub.f32 %v1063_v30, %v1047_v35  ;;  %v1078_v20 = vsel %vm2952_vm8, %v1070_v10, %v1046_v59  ;;  %v1077_v41 = vsel %vm2932_vm6, %v1069_v13, %v1045_v16  ;;  %vm3632_vm5 = vmmov %vm3630_vm2  ;;  %v1314_v16 = vpop.permute.xlu0 %1313 }
 0x231   : > { %v1096_v61 = vmul.f32 %v1078_v20, %v1078_v20  ;;  %v1095_v48 = vmul.f32 %v1077_v41, %v1077_v41  ;;  %v1073_v11 = vsel %vm2922_vm3, %v1065_v63, %v1041_v31  ;;  %v1092_v22 = vmul.f32 %v1074_v62, %v1074_v62  ;;  %vm3631_vm3 = vmmov %vm3630_vm2 }
 0x232   : > { %v1072_v60 = vsub.f32 %v1064_v57, %v1048_v12  ;;  %v1079_v26 = vsel %vm2970_vm9, %v1071_v36, %v1047_v35  ;;  %v1091_v23 = vmul.f32 %v1073_v11, %v1073_v11  ;;  %vm3633_vm6 = vmmov %vm3630_vm2 }
 0x233   : > { %v1097_v2 = vmul.f32 %v1079_v26, %v1079_v26  ;;  %vm3634_vm7 = vmmov %vm3630_vm2 }
 0x234   : > { %v1080_v44 = vsel %vm3007_vm10, %v1072_v60, %v1048_v12  ;;  %vm3635_vm8 = vmmov %vm3630_vm2 }
 0x235   : > { %v1098_v5 = vmul.f32 %v1080_v44, %v1080_v44  ;;  %1236 = vmatprep.subr.mxu0 %v1080_v44  ;;  %vm3636_vm9 = vmmov %vm3630_vm2 }
 0x236   : > { %1237 = vmatpush1.msra.mxu0 %v1079_v26 }
 0x237   : > { %1135 = vmatprep.subr.mxu1 %v1098_v5  ;;  %1238 = vmatprep.subr.mxu0 %v1078_v20 }
 0x238   : > { %1136 = vmatpush1.msra.mxu1 %v1097_v2  ;;  %1239 = vmatpush1.msra.mxu0 %v1077_v41 }
 0x239   : > { %1137 = vmatprep.subr.mxu1 %v1096_v61  ;;  %1240 = vmatprep.subr.mxu0 %v1076_v4 }
 0x23a   : > { %1138 = vmatpush1.msra.mxu1 %v1095_v48  ;;  %1241 = vmatpush1.msra.mxu0 %v1075_v29 }
 0x23b   : > { %1139 = vmatprep.subr.mxu1 %v1094_v17  ;;  %1242 = vmatprep.subr.mxu0 %v1074_v62 }
 0x23c   : > { %1140 = vmatpush1.msra.mxu1 %v1093_v19  ;;  %1243 = vmatpush1.msra.mxu0 %v1073_v11  ;;  %v1508_v19 = vld [vmem:[#allocation2 + $0x40] sm:$0xff] }
 0x23d   : > { %1141 = vmatprep.subr.mxu1 %v1092_v22  ;;  %2212 = vmatmul.mubr.msk.f32.vlgmr.msra.gmra.mxu0 %vm3629_vm4, %v2204_v9  ;;  %v2221_v9 = vld [vmem:[%s3586_s3 + $0x48] sm:$0xff] }
 0x23e   : > { %1142 = vmatpush1.msra.mxu1 %v1091_v23  ;;  %1282 = vmatprep.mubr.f32.mxu0 %v2460_v0 }
 0x23f   : > { %2208 = vmatmul.mubr.msk.f32.vlgmr.msra.gmra.mxu1 %vm3630_vm2, %v1087_v6  ;;  %v2220_v6 = vld [vmem:[%s3586_s3 + $0x40] sm:$0xff] }
 0x240   : > { %1181 = vmatprep.mubr.f32.mxu1 %v2460_v0 }
 0x241   : > { %2213 = vmatmul.mubr.msk.f32.gmra.mxu0 %vm3631_vm3, %v2205_v7 }
 0x242   : > { %1288 = vmatprep.mubr.f32.mxu0 %v2460_v0 }
 0x243   : > { %2209 = vmatmul.mubr.msk.f32.gmra.mxu1 %vm3632_vm5, %v1088_v25 }
 0x244   : > { %1187 = vmatprep.mubr.f32.mxu1 %v2460_v0 }
 0x245   : > { %2214 = vmatmul.mubr.msk.f32.gmra.mxu0 %vm3633_vm6, %v2206_v27 }
 0x246   : > { %1294 = vmatprep.mubr.f32.mxu0 %v2460_v0 }
 0x247   : > { %2210 = vmatmul.mubr.msk.f32.gmra.mxu1 %vm3634_vm7, %v1089_v8 }
 0x248   : > { %1193 = vmatprep.mubr.f32.mxu1 %v2460_v0 }
 0x249   : > { %2215 = vmatmul.mubr.msk.f32.gmra.mxu0 %vm3635_vm8, %v2207_v56 }
 0x24a   : > { %1697 = vmatprep.mubr.f32.mxu0 %v2460_v0 }
 0x24b   : > { %2211 = vmatmul.mubr.msk.f32.gmra.mxu1 %vm3636_vm9, %v1090_v39 }
 0x24c   : > { %1596 = vmatprep.mubr.f32.mxu1 %v2460_v0 }
 0x2fd   : > { %v1278_v45 = vpop.f32.mrf.mxu0 }
 0x2ff   : > { %v1177_v1 = vpop.f32.mrf.mxu1  ;;  %v1280_v51 = vpop.f32.mrf.mxu0 }
 0x300   : > { %v1279_v40 = vadd.f32 %v1278_v45, %v1177_v1 }
 0x301   : > { %v1179_v38 = vpop.f32.mrf.mxu1  ;;  %v1284_v47 = vpop.f32.mrf.mxu0 }
 0x302   : > { %v3113_v55 = vadd.f32 %v1309_v46, %v1279_v40  ;;  %v1281_v24 = vadd.f32 %v1280_v51, %v1179_v38 }
 0x303   : > { %v1183_v59 = vpop.f32.mrf.mxu1  ;;  %v1286_v21 = vpop.f32.mrf.mxu0 }
 0x304   : > { %2333 = vrcp.f32 %v3113_v55  ;;  %v3116_v14 = vadd.f32 %v1309_v46, %v1281_v24  ;;  %v1285_v52 = vadd.f32 %v1284_v47, %v1183_v59  ;;  %v1334_v54 = vand.u32 2147483647, %v3113_v55 }
 0x305   : > { %v1185_v35 = vpop.f32.mrf.mxu1  ;;  %v1290_v3 = vpop.f32.mrf.mxu0  ;;  %vm1470_vm2 = vcmp.lt.f32.partialorder %v3113_v55, 0.0 }
 0x306   : > { %2335 = vrcp.f32 %v3116_v14  ;;  %v3119_v30 = vadd.f32 %v1314_v16, %v1285_v52  ;;  %v1287_v33 = vadd.f32 %v1286_v21, %v1185_v35  ;;  %v1335_v28 = vand.u32 2147483647, %v3116_v14 }
 0x307   : > { %v1189_v15 = vpop.f32.mrf.mxu1  ;;  %v1292_v53 = vpop.f32.mrf.mxu0  ;;  %vm3150_vm11 = vcmp.gt.f32.partialorder %v1334_v54, 1.0  ;;  %vm1471_vm4 = vcmp.lt.f32.partialorder %v3116_v14, 0.0 }
 0x308   : > { %2337 = vrcp.f32 %v3119_v30  ;;  %v3122_v12 = vadd.f32 %v1314_v16, %v1287_v33  ;;  %v1291_v36 = vadd.f32 %v1290_v3, %v1189_v15  ;;  %v1336_v41 = vand.u32 2147483647, %v3119_v30 }
 0x309   : > { %v1191_v10 = vpop.f32.mrf.mxu1  ;;  %v1296_v42 = vpop.f32.mrf.mxu0  ;;  %vm3146_vm10 = vcmp.gt.f32.partialorder %v1335_v28, 1.0  ;;  %vm1472_vm8 = vcmp.lt.f32.partialorder %v3119_v30, 0.0 }
 0x30a   : > { %2339 = vrcp.f32 %v3122_v12  ;;  %v3125_v57 = vadd.f32 %v1319_v18, %v1291_v36  ;;  %v1293_v13 = vadd.f32 %v1292_v53, %v1191_v10  ;;  %v1337_v61 = vand.u32 2147483647, %v3122_v12 }
 0x30b   : > { %v1195_v50 = vpop.f32.mrf.mxu1  ;;  %v1298_v49 = vpop.f32.mrf.mxu0  ;;  %vm3155_vm12 = vcmp.gt.f32.partialorder %v1336_v41, 1.0  ;;  %vm1473_vm7 = vcmp.lt.f32.partialorder %v3122_v12, 0.0 }
 0x30c   : > { %2341 = vrcp.f32 %v3125_v57  ;;  %v3128_v31 = vadd.f32 %v1319_v18, %v1293_v13  ;;  %v1297_v60 = vadd.f32 %v1296_v42, %v1195_v50  ;;  %v1338_v4 = vand.u32 2147483647, %v3125_v57 }
 0x30d   : > { %v1197_v34 = vpop.f32.mrf.mxu1  ;;  %vm3164_vm14 = vcmp.gt.f32.partialorder %v1337_v61, 1.0  ;;  %vm1474_vm6 = vcmp.lt.f32.partialorder %v3125_v57, 0.0 }
 0x30e   : > { %2343 = vrcp.f32 %v3128_v31  ;;  %v3131_v26 = vadd.f32 %v1324_v32, %v1297_v60  ;;  %v1299_v58 = vadd.f32 %v1298_v49, %v1197_v34  ;;  %v1339_v11 = vand.u32 2147483647, %v3128_v31 }
 0x30f   : > { %vm3160_vm13 = vcmp.gt.f32.partialorder %v1338_v4, 1.0  ;;  %vm1475_vm5 = vcmp.lt.f32.partialorder %v3128_v31, 0.0 }
 0x310   : > { %2345 = vrcp.f32 %v3131_v26  ;;  %v3134_v37 = vadd.f32 %v1324_v32, %v1299_v58  ;;  %v1340_v8 = vand.u32 2147483647, %v3131_v26  ;;  %vm3180_vm15 = vcmp.gt.f32.partialorder %v1339_v11, 1.0 }
 0x311   : > { %v2334_v44 = vpop.eup %2333  ;;  %vm1476_vm3 = vcmp.lt.f32.partialorder %v3131_v26, 0.0 }
 0x312   : > { %2347 = vrcp.f32 %v3134_v37  ;;  %v1358_v5 = vmul.f32 %v2334_v44, %v3113_v55  ;;  %v1341_v40 = vand.u32 2147483647, %v3134_v37  ;;  %vm3198_vm0 = vcmp.gt.f32.partialorder %v1340_v8, 1.0 }
 0x313   : > { %v2336_v20 = vpop.eup %2335  ;;  %vm1477_vm9 = vcmp.lt.f32.partialorder %v3134_v37, 0.0 }
 0x314   : > { %v1359_v63 = vmul.f32 %v2336_v20, %v3116_v14  ;;  %v1366_v29 = vsub.f32 2.0, %v1358_v5  ;;  %vm3235_vm1 = vcmp.gt.f32.partialorder %v1341_v40, 1.0 }
 0x315   : > { %v2338_v2 = vpop.eup %2337 }
 0x316   : > { %v1360_v48 = vmul.f32 %v2338_v2, %v3119_v30  ;;  %v1367_v62 = vsub.f32 2.0, %v1359_v63  ;;  %v1374_v22 = vmul.f32 %v2334_v44, %v1366_v29 }
 0x317   : > { %v2340_v17 = vpop.eup %2339 }
 0x318   : > { %v1361_v23 = vmul.f32 %v2340_v17, %v3122_v12  ;;  %v1368_v7 = vsub.f32 2.0, %v1360_v48  ;;  %v1375_v25 = vmul.f32 %v2336_v20, %v1367_v62  ;;  %v3171_v18 = vsel %vm3150_vm11, %v1374_v22, %v3113_v55 }
 0x319   : > { %v2342_v27 = vpop.eup %2341  ;;  %v3190_v24 = vmul.f32 %v3171_v18, %v3171_v18 }
 0x31a   : > { %v1362_v45 = vmul.f32 %v2342_v27, %v3125_v57  ;;  %v1369_v32 = vsub.f32 2.0, %v1361_v23  ;;  %v1376_v1 = vmul.f32 %v2338_v2, %v1368_v7  ;;  %v3177_v51 = vsel %vm3146_vm10, %v1375_v25, %v3116_v14 }
 0x31b   : > { %v2344_v46 = vpop.eup %2343  ;;  %v3186_v47 = vmul.f32 %v3177_v51, %v3177_v51  ;;  %v1398_v53 = vmul.f32 0.0208351, %v3190_v24 }
 0x31c   : > { %v1363_v59 = vmul.f32 %v2344_v46, %v3128_v31  ;;  %v1370_v21 = vsub.f32 2.0, %v1362_v45  ;;  %v1377_v16 = vmul.f32 %v2340_v17, %v1369_v32  ;;  %v3196_v52 = vsel %vm3155_vm12, %v1376_v1, %v3119_v30 }
 0x31d   : > { %v2346_v35 = vpop.eup %2345  ;;  %v3204_v33 = vmul.f32 %v3196_v52, %v3196_v52  ;;  %v1399_v15 = vmul.f32 0.0208351, %v3186_v47  ;;  %v1406_v58 = vadd.f32 -0.085133, %v1398_v53  ;;  %v1478_v30 = vsel %vm1470_vm2, -1.5707964, %v2462_v43 }
 0x31e   : > { %v1364_v36 = vmul.f32 %v2346_v35, %v3131_v26  ;;  %v1371_v10 = vsub.f32 2.0, %v1363_v59  ;;  %v1378_v42 = vmul.f32 %v2342_v27, %v1370_v21  ;;  %v3212_v13 = vsel %vm3164_vm14, %v1377_v16, %v3122_v12 }
 0x31f   : > { %v2348_v50 = vpop.eup %2347  ;;  %v1393_v60 = vmul.f32 %v3212_v13, %v3212_v13  ;;  %v1400_v49 = vmul.f32 0.0208351, %v3204_v33  ;;  %v1407_v34 = vadd.f32 -0.085133, %v1399_v15  ;;  %v1414_v48 = vmul.f32 %v1406_v58, %v3190_v24 }
 0x320   : > { %v1365_v44 = vmul.f32 %v2348_v50, %v3134_v37  ;;  %v1372_v20 = vsub.f32 2.0, %v1364_v36  ;;  %v1379_v28 = vmul.f32 %v2344_v46, %v1371_v10  ;;  %v3221_v54 = vsel %vm3160_vm13, %v1378_v42, %v3125_v57 }
 0x321   : > { %v1394_v5 = vmul.f32 %v3221_v54, %v3221_v54  ;;  %v1401_v41 = vmul.f32 0.0208351, %v1393_v60  ;;  %v1408_v63 = vadd.f32 -0.085133, %v1400_v49  ;;  %v1415_v2 = vmul.f32 %v1407_v34, %v3186_v47 }
 0x322   : > { %v1373_v4 = vsub.f32 2.0, %v1365_v44  ;;  %v1380_v61 = vmul.f32 %v2346_v35, %v1372_v20  ;;  %v3229_v29 = vsel %vm3180_vm15, %v1379_v28, %v3128_v31  ;;  %v1422_v59 = vadd.f32 0.180141, %v1414_v48 }
 0x323   : > { %v1395_v62 = vmul.f32 %v3229_v29, %v3229_v29  ;;  %v1402_v17 = vmul.f32 0.0208351, %v1394_v5  ;;  %v1409_v11 = vadd.f32 -0.085133, %v1401_v41  ;;  %v1416_v22 = vmul.f32 %v1408_v63, %v3204_v33 }
 0x324   : > { %v1381_v7 = vmul.f32 %v2348_v50, %v1373_v4  ;;  %v3242_v25 = vsel %vm3198_vm0, %v1380_v61, %v3131_v26  ;;  %v1423_v27 = vadd.f32 0.180141, %v1415_v2  ;;  %v1430_v44 = vmul.f32 %v1422_v59, %v3190_v24 }
 0x325   : > { %v1396_v8 = vmul.f32 %v3242_v25, %v3242_v25  ;;  %v1403_v45 = vmul.f32 0.0208351, %v1395_v62  ;;  %v1410_v32 = vadd.f32 -0.085133, %v1402_v17  ;;  %v1417_v1 = vmul.f32 %v1409_v11, %v1393_v60 }
 0x326   : > { %v3249_v46 = vsel %vm3235_vm1, %v1381_v7, %v3134_v37  ;;  %v1424_v40 = vadd.f32 0.180141, %v1416_v22  ;;  %v1431_v10 = vmul.f32 %v1423_v27, %v3186_v47  ;;  %v1438_v27 = vadd.f32 -0.3302995, %v1430_v44 }
 0x327   : > { %v1397_v21 = vmul.f32 %v3249_v46, %v3249_v46  ;;  %v1404_v16 = vmul.f32 0.0208351, %v1396_v8  ;;  %v1411_v35 = vadd.f32 -0.085133, %v1403_v45  ;;  %v1418_v15 = vmul.f32 %v1410_v32, %v1394_v5 }
 0x328   : > { %v1425_v53 = vadd.f32 0.180141, %v1417_v1  ;;  %v1432_v36 = vmul.f32 %v1424_v40, %v3204_v33  ;;  %v1439_v61 = vadd.f32 -0.3302995, %v1431_v10  ;;  %v1481_v31 = vsel %vm1473_vm7, -1.5707964, %v2462_v43 }
 0x329   : > { %v1405_v42 = vmul.f32 0.0208351, %v1397_v21  ;;  %v1412_v50 = vadd.f32 -0.085133, %v1404_v16  ;;  %v1419_v49 = vmul.f32 %v1411_v35, %v1395_v62  ;;  %v1426_v34 = vadd.f32 0.180141, %v1418_v15 }
 0x32a   : > { %v1433_v58 = vmul.f32 %v1425_v53, %v1393_v60  ;;  %v1440_v4 = vadd.f32 -0.3302995, %v1432_v36  ;;  %v1447_v53 = vmul.f32 %v1439_v61, %v3186_v47  ;;  %v1446_v36 = vmul.f32 %v1438_v27, %v3190_v24 }
 0x32b   : > { %v1413_v20 = vadd.f32 -0.085133, %v1405_v42  ;;  %v1420_v28 = vmul.f32 %v1412_v50, %v1396_v8  ;;  %v1427_v41 = vadd.f32 0.180141, %v1419_v49  ;;  %v1434_v63 = vmul.f32 %v1426_v34, %v1394_v5 }
 0x32c   : > { %v1441_v2 = vadd.f32 -0.3302995, %v1433_v58  ;;  %v1448_v16 = vmul.f32 %v1440_v4, %v3204_v33  ;;  %v1455_v34 = vadd.f32 0.999866, %v1447_v53 }
 0x32d   : > { %v1421_v48 = vmul.f32 %v1413_v20, %v1397_v21  ;;  %v1428_v17 = vadd.f32 0.180141, %v1420_v28  ;;  %v1435_v11 = vmul.f32 %v1427_v41, %v1395_v62  ;;  %v1442_v22 = vadd.f32 -0.3302995, %v1434_v63 }
 0x32e   : > { %v1449_v7 = vmul.f32 %v1441_v2, %v1393_v60  ;;  %v1456_v33 = vadd.f32 0.999866, %v1448_v16  ;;  %v1485_v63 = vsel %vm1477_vm9, -1.5707964, %v2462_v43  ;;  %v1510_v16 = vld [vmem:[#allocation2 + $0x50] sm:$0xff] }
 0x32f   : > { %v1429_v45 = vadd.f32 0.180141, %v1421_v48  ;;  %v1436_v32 = vmul.f32 %v1428_v17, %v1396_v8  ;;  %v1443_v1 = vadd.f32 -0.3302995, %v1435_v11  ;;  %v1450_v40 = vmul.f32 %v1442_v22, %v1394_v5 }
 0x330   : > { %v1457_v49 = vadd.f32 0.999866, %v1449_v7  ;;  %v1464_v28 = vmul.f32 %v1456_v33, %v3196_v52  ;;  %v1480_v52 = vsel %vm1472_vm8, -1.5707964, %v2462_v43 }
 0x331   : > { %v1437_v59 = vmul.f32 %v1429_v45, %v1397_v21  ;;  %v1444_v35 = vadd.f32 -0.3302995, %v1436_v32  ;;  %v1451_v15 = vmul.f32 %v1443_v1, %v1395_v62  ;;  %v1458_v42 = vadd.f32 0.999866, %v1450_v40  ;;  %v1509_v1 = vld [vmem:[#allocation2 + $0x48] sm:$0xff]  ;;  %v2222_v40 = vld [vmem:[%s3586_s3 + $0x50] sm:$0xff] }
 0x332   : > { %v1465_v20 = vmul.f32 %v1457_v49, %v3212_v13  ;;  %v1463_v13 = vmul.f32 %v1455_v34, %v3177_v51  ;;  %v1488_v61 = vsub.f32 %v1480_v52, %v1464_v28  ;;  %v1479_v51 = vsel %vm1471_vm4, -1.5707964, %v2462_v43 }
 0x333   : > { %v1445_v60 = vadd.f32 -0.3302995, %v1437_v59  ;;  %v1452_v10 = vmul.f32 %v1444_v35, %v1396_v8  ;;  %v1459_v50 = vadd.f32 0.999866, %v1451_v15  ;;  %v1466_v24 = vmul.f32 %v1458_v42, %v3221_v54  ;;  %v2223_v59 = vld [vmem:[%s3586_s3 + $0x58] sm:$0xff]  ;;  %v1740_v15 = vpop.permute.xlu1 %1739  ;;  %v1745_v42 = vpop.permute.xlu0 %1744 }
 0x334   : > { %v1454_v8 = vadd.f32 0.999866, %v1446_v36  ;;  %v1483_v54 = vsel %vm1475_vm5, -1.5707964, %v2462_v43  ;;  %v1489_v57 = vsub.f32 %v1481_v31, %v1465_v20  ;;  %v1487_v48 = vsub.f32 %v1479_v51, %v1463_v13  ;;  %v1511_v35 = vld [vmem:[#allocation2 + $0x58] sm:$0xff] }
 0x335   : > { %v1453_v5 = vmul.f32 %v1445_v60, %v1397_v21  ;;  %v1460_v47 = vadd.f32 0.999866, %v1452_v10  ;;  %v1467_v62 = vmul.f32 %v1459_v50, %v3229_v29  ;;  %v1484_v21 = vsel %vm1476_vm3, -1.5707964, %v2462_v43 }
 0x336   : > { %v1482_v29 = vsel %vm1474_vm6, -1.5707964, %v2462_v43  ;;  %v1462_v2 = vmul.f32 %v1454_v8, %v3171_v18  ;;  %v1497_v14 = vsel %vm3164_vm14, %v1489_v57, %v1465_v20  ;;  %v1496_v38 = vsel %vm3155_vm12, %v1488_v61, %v1464_v28 }
 0x337   : > { %v1461_v58 = vadd.f32 0.999866, %v1453_v5  ;;  %v1468_v44 = vmul.f32 %v1460_v47, %v3242_v25  ;;  %v1491_v25 = vsub.f32 %v1483_v54, %v1467_v62  ;;  %v1490_v26 = vsub.f32 %v1482_v29, %v1466_v24  ;;  %v1730_v10 = vpop.permute.xlu1 %1729 }
 0x338   : > { %v1486_v11 = vsub.f32 %v1478_v30, %v1462_v2  ;;  %v1495_v7 = vsel %vm3146_vm10, %v1487_v48, %v1463_v13  ;;  %v1515_v56 = vmul.f32 %v1497_v14, %v1497_v14  ;;  %v1514_v39 = vmul.f32 %v1496_v38, %v1496_v38 }
 0x339   : > { %v1469_v37 = vmul.f32 %v1461_v58, %v3249_v46  ;;  %v1492_v41 = vsub.f32 %v1484_v21, %v1468_v44  ;;  %v1499_v18 = vsel %vm3180_vm15, %v1491_v25, %v1467_v62  ;;  %v1498_v3 = vsel %vm3160_vm13, %v1490_v26, %v1466_v24  ;;  %v1735_v24 = vpop.permute.xlu0 %1734 }
 0x33a   : > { %v1517_v23 = vmul.f32 %v1499_v18, %v1499_v18  ;;  %v1516_v55 = vmul.f32 %v1498_v3, %v1498_v3  ;;  %v1494_v27 = vsel %vm3150_vm11, %v1486_v11, %v1462_v2  ;;  %v1513_v45 = vmul.f32 %v1495_v7, %v1495_v7 }
 0x33b   : > { %v1493_v4 = vsub.f32 %v1485_v63, %v1469_v37  ;;  %v1500_v46 = vsel %vm3198_vm0, %v1492_v41, %v1468_v44  ;;  %v1512_v32 = vmul.f32 %v1494_v27, %v1494_v27  ;;  %vm3653_vm10 = vcmask 261120  }
 0x33c   : > { %v1518_v22 = vmul.f32 %v1500_v46, %v1500_v46  ;;  %vm3654_vm11 = vmmov %vm3653_vm10 }
 0x33d   : > { %v1501_v12 = vsel %vm3235_vm1, %v1493_v4, %v1469_v37  ;;  %vm3655_vm12 = vmmov %vm3653_vm10 }
 0x33e   : > { %v1519_v17 = vmul.f32 %v1501_v12, %v1501_v12  ;;  %1657 = vmatprep.subr.mxu0 %v1501_v12  ;;  %vm3656_vm13 = vmmov %vm3653_vm10 }
 0x33f   : > { %1658 = vmatpush1.msra.mxu0 %v1500_v46  ;;  %vm3657_vm14 = vmmov %vm3653_vm10 }
 0x340   : > { %1556 = vmatprep.subr.mxu1 %v1519_v17  ;;  %1659 = vmatprep.subr.mxu0 %v1499_v18  ;;  %vm3658_vm15 = vmmov %vm3653_vm10 }
 0x341   : > { %1557 = vmatpush1.msra.mxu1 %v1518_v22  ;;  %1660 = vmatpush1.msra.mxu0 %v1498_v3  ;;  %vm3659_vm0 = vmmov %vm3653_vm10 }
 0x342   : > { %1558 = vmatprep.subr.mxu1 %v1517_v23  ;;  %1661 = vmatprep.subr.mxu0 %v1497_v14  ;;  %vm3660_vm1 = vmmov %vm3659_vm0 }
 0x343   : > { %1559 = vmatpush1.msra.mxu1 %v1516_v55  ;;  %1662 = vmatpush1.msra.mxu0 %v1496_v38 }
 0x344   : > { %1560 = vmatprep.subr.mxu1 %v1515_v56  ;;  %1663 = vmatprep.subr.mxu0 %v1495_v7 }
 0x345   : > { %1561 = vmatpush1.msra.mxu1 %v1514_v39  ;;  %1664 = vmatpush1.msra.mxu0 %v1494_v27 }
 0x346   : > { %1562 = vmatprep.subr.mxu1 %v1513_v45  ;;  %2228 = vmatmul.mubr.msk.f32.vlgmr.msra.gmra.mxu0 %vm3653_vm10, %v2220_v6  ;;  %v1923_v6 = vld [vmem:[%s3589_s6] sm:$0x7] }
 0x347   : > { %1563 = vmatpush1.msra.mxu1 %v1512_v32  ;;  %1703 = vmatprep.mubr.f32.mxu0 %v2460_v0 }
 0x348   : > { %2224 = vmatmul.mubr.msk.f32.vlgmr.msra.gmra.mxu1 %vm3654_vm11, %v1508_v19 }
 0x349   : > { %1602 = vmatprep.mubr.f32.mxu1 %v2460_v0 }
 0x34a   : > { %2229 = vmatmul.mubr.msk.f32.gmra.mxu0 %vm3655_vm12, %v2221_v9 }
 0x34b   : > { %1709 = vmatprep.mubr.f32.mxu0 %v2460_v0 }
 0x34c   : > { %2225 = vmatmul.mubr.msk.f32.gmra.mxu1 %vm3656_vm13, %v1509_v1 }
 0x34d   : > { %1608 = vmatprep.mubr.f32.mxu1 %v2460_v0 }
 0x34e   : > { %2230 = vmatmul.mubr.msk.f32.gmra.mxu0 %vm3657_vm14, %v2222_v40 }
 0x34f   : > { %1715 = vmatprep.mubr.f32.mxu0 %v2460_v0 }
 0x350   : > { %2226 = vmatmul.mubr.msk.f32.gmra.mxu1 %vm3658_vm15, %v1510_v16 }
 0x351   : > { %1614 = vmatprep.mubr.f32.mxu1 %v2460_v0 }
 0x352   : > { %2231 = vmatmul.mubr.msk.f32.gmra.mxu0 %vm3659_vm0, %v2223_v59 }
 0x354   : > { %2227 = vmatmul.mubr.msk.f32.gmra.mxu1 %vm3660_vm1, %v1511_v35  ;;  %v1924_v35 = vld [vmem:[%s3590_s7] sm:$0x7] }
 0x355   : > { %2000 = vmatprep.mubr.f32.mxu1 %v2460_v0 }
 0x406   : > { %v1699_v53 = vpop.f32.mrf.mxu0 }
 0x408   : > { %v1598_v36 = vpop.f32.mrf.mxu1  ;;  %v1701_v60 = vpop.f32.mrf.mxu0 }
 0x409   : > { %v1700_v50 = vadd.f32 %v1699_v53, %v1598_v36 }
 0x40a   : > { %v1600_v49 = vpop.f32.mrf.mxu1  ;;  %v1705_v33 = vpop.f32.mrf.mxu0 }
 0x40b   : > { %v3340_v5 = vadd.f32 %v1730_v10, %v1700_v50  ;;  %v1702_v47 = vadd.f32 %v1701_v60, %v1600_v49 }
 0x40c   : > { %v1604_v62 = vpop.f32.mrf.mxu1  ;;  %v1707_v34 = vpop.f32.mrf.mxu0 }
 0x40d   : > { %2349 = vrcp.f32 %v3340_v5  ;;  %v3343_v8 = vadd.f32 %v1730_v10, %v1702_v47  ;;  %v1706_v58 = vadd.f32 %v1705_v33, %v1604_v62  ;;  %v1755_v17 = vand.u32 2147483647, %v3340_v5 }
 0x40e   : > { %v1606_v44 = vpop.f32.mrf.mxu1  ;;  %v1711_v20 = vpop.f32.mrf.mxu0  ;;  %vm1891_vm11 = vcmp.lt.f32.partialorder %v3340_v5, 0.0 }
 0x40f   : > { %2351 = vrcp.f32 %v3343_v8  ;;  %v3346_v21 = vadd.f32 %v1735_v24, %v1706_v58  ;;  %v1708_v54 = vadd.f32 %v1707_v34, %v1606_v44  ;;  %v1756_v30 = vand.u32 2147483647, %v3343_v8 }
 0x410   : > { %v1610_v29 = vpop.f32.mrf.mxu1  ;;  %v1713_v28 = vpop.f32.mrf.mxu0  ;;  %vm3377_vm2 = vcmp.gt.f32.partialorder %v1755_v17, 1.0  ;;  %vm1892_vm10 = vcmp.lt.f32.partialorder %v3343_v8, 0.0 }
 0x411   : > { %2353 = vrcp.f32 %v3346_v21  ;;  %v3349_v37 = vadd.f32 %v1735_v24, %v1708_v54  ;;  %v1712_v41 = vadd.f32 %v1711_v20, %v1610_v29  ;;  %v1757_v38 = vand.u32 2147483647, %v3346_v21 }
 0x412   : > { %v1612_v25 = vpop.f32.mrf.mxu1  ;;  %v1717_v13 = vpop.f32.mrf.mxu0  ;;  %vm3373_vm4 = vcmp.gt.f32.partialorder %v1756_v30, 1.0  ;;  %vm1893_vm0 = vcmp.lt.f32.partialorder %v3346_v21, 0.0 }
 0x413   : > { %2355 = vrcp.f32 %v3349_v37  ;;  %v3352_v63 = vadd.f32 %v1740_v15, %v1712_v41  ;;  %v1714_v26 = vadd.f32 %v1713_v28, %v1612_v25  ;;  %v1758_v23 = vand.u32 2147483647, %v3349_v37 }
 0x414   : > { %v1616_v31 = vpop.f32.mrf.mxu1  ;;  %v1719_v57 = vpop.f32.mrf.mxu0  ;;  %vm3395_vm6 = vcmp.gt.f32.partialorder %v1757_v38, 1.0  ;;  %vm1894_vm15 = vcmp.lt.f32.partialorder %v3349_v37, 0.0 }
 0x415   : > { %2357 = vrcp.f32 %v3352_v63  ;;  %v3355_v2 = vadd.f32 %v1740_v15, %v1714_v26  ;;  %v1718_v4 = vadd.f32 %v1717_v13, %v1616_v31  ;;  %v1759_v14 = vand.u32 2147483647, %v3352_v63 }
 0x416   : > { %v1618_v52 = vpop.f32.mrf.mxu1  ;;  %vm3391_vm5 = vcmp.gt.f32.partialorder %v1758_v23, 1.0  ;;  %vm1895_vm14 = vcmp.lt.f32.partialorder %v3352_v63, 0.0 }
 0x417   : > { %2359 = vrcp.f32 %v3355_v2  ;;  %v3358_v46 = vadd.f32 %v1745_v42, %v1718_v4  ;;  %v1720_v61 = vadd.f32 %v1719_v57, %v1618_v52  ;;  %v1760_v39 = vand.u32 2147483647, %v3355_v2 }
 0x418   : > { %vm3387_vm3 = vcmp.gt.f32.partialorder %v1759_v14, 1.0  ;;  %vm1896_vm13 = vcmp.lt.f32.partialorder %v3355_v2, 0.0 }
 0x419   : > { %2361 = vrcp.f32 %v3358_v46  ;;  %v3361_v51 = vadd.f32 %v1745_v42, %v1720_v61  ;;  %v1761_v50 = vand.u32 2147483647, %v3358_v46  ;;  %vm3410_vm7 = vcmp.gt.f32.partialorder %v1760_v39, 1.0 }
 0x41a   : > { %v2350_v12 = vpop.eup %2349  ;;  %vm1897_vm12 = vcmp.lt.f32.partialorder %v3358_v46, 0.0 }
 0x41b   : > { %v1779_v18 = vmul.f32 %v2350_v12, %v3340_v5  ;;  %2363 = vrcp.f32 %v3361_v51  ;;  %v1762_v20 = vand.u32 2147483647, %v3361_v51  ;;  %vm3437_vm8 = vcmp.gt.f32.partialorder %v1761_v50, 1.0 }
 0x41c   : > { %v2352_v48 = vpop.eup %2351  ;;  %vm1898_vm1 = vcmp.lt.f32.partialorder %v3361_v51, 0.0 }
 0x41d   : > { %v1787_v3 = vsub.f32 2.0, %v1779_v18  ;;  %v1780_v11 = vmul.f32 %v2352_v48, %v3343_v8  ;;  %vm3462_vm9 = vcmp.gt.f32.partialorder %v1762_v20, 1.0 }
 0x41e   : > { %v2354_v22 = vpop.eup %2353 }
 0x41f   : > { %v1788_v55 = vsub.f32 2.0, %v1780_v11  ;;  %v1781_v7 = vmul.f32 %v2354_v22, %v3346_v21  ;;  %v1795_v56 = vmul.f32 %v2350_v12, %v1787_v3 }
 0x420   : > { %v2356_v27 = vpop.eup %2355 }
 0x421   : > { %v1789_v32 = vsub.f32 2.0, %v1781_v7  ;;  %v1782_v19 = vmul.f32 %v2356_v27, %v3349_v37  ;;  %v1796_v9 = vmul.f32 %v2352_v48, %v1788_v55  ;;  %v3385_v1 = vsel %vm3377_vm2, %v1795_v56, %v3340_v5 }
 0x422   : > { %v2358_v40 = vpop.eup %2357  ;;  %v3401_v15 = vmul.f32 %v3385_v1, %v3385_v1 }
 0x423   : > { %v1790_v53 = vsub.f32 2.0, %v1782_v19  ;;  %v1783_v42 = vmul.f32 %v2358_v40, %v3352_v63  ;;  %v1797_v36 = vmul.f32 %v2354_v22, %v1789_v32  ;;  %v3407_v60 = vsel %vm3373_vm4, %v1796_v9, %v3343_v8 }
 0x424   : > { %v2360_v10 = vpop.eup %2359  ;;  %v3416_v33 = vmul.f32 %v3407_v60, %v3407_v60  ;;  %v1819_v47 = vmul.f32 0.0208351, %v3401_v15 }
 0x425   : > { %v1791_v62 = vsub.f32 2.0, %v1783_v42  ;;  %v1784_v34 = vmul.f32 %v2360_v10, %v3355_v2  ;;  %v1798_v24 = vmul.f32 %v2356_v27, %v1790_v53  ;;  %v3423_v58 = vsel %vm3395_vm6, %v1797_v36, %v3346_v21 }
 0x426   : > { %v2362_v44 = vpop.eup %2361  ;;  %v3428_v54 = vmul.f32 %v3423_v58, %v3423_v58  ;;  %v1820_v29 = vmul.f32 0.0208351, %v3416_v33  ;;  %v1827_v28 = vadd.f32 -0.085133, %v1819_v47  ;;  %v1899_v21 = vsel %vm1891_vm11, -1.5707964, %v2462_v43 }
 0x427   : > { %v1792_v41 = vsub.f32 2.0, %v1784_v34  ;;  %v1785_v25 = vmul.f32 %v2362_v44, %v3358_v46  ;;  %v1799_v13 = vmul.f32 %v2358_v40, %v1791_v62  ;;  %v3435_v26 = vsel %vm3391_vm5, %v1798_v24, %v3349_v37 }
 0x428   : > { %v2364_v31 = vpop.eup %2363  ;;  %v1814_v57 = vmul.f32 %v3435_v26, %v3435_v26  ;;  %v1821_v52 = vmul.f32 0.0208351, %v3428_v54  ;;  %v1828_v61 = vadd.f32 -0.085133, %v1820_v29  ;;  %v1835_v55 = vmul.f32 %v1827_v28, %v3401_v15 }
 0x429   : > { %v1793_v12 = vsub.f32 2.0, %v1785_v25  ;;  %v1786_v18 = vmul.f32 %v2364_v31, %v3361_v51  ;;  %v1800_v48 = vmul.f32 %v2360_v10, %v1792_v41  ;;  %v3448_v30 = vsel %vm3387_vm3, %v1799_v13, %v3352_v63 }
 0x42a   : > { %v1815_v17 = vmul.f32 %v3448_v30, %v3448_v30  ;;  %v1822_v3 = vmul.f32 0.0208351, %v1814_v57  ;;  %v1829_v11 = vadd.f32 -0.085133, %v1821_v52  ;;  %v1836_v22 = vmul.f32 %v1828_v61, %v3416_v33 }
 0x42b   : > { %v1794_v14 = vsub.f32 2.0, %v1786_v18  ;;  %v1801_v23 = vmul.f32 %v2362_v44, %v1793_v12  ;;  %v3456_v38 = vsel %vm3410_vm7, %v1800_v48, %v3355_v2  ;;  %v1843_v62 = vadd.f32 0.180141, %v1835_v55 }
 0x42c   : > { %v1816_v7 = vmul.f32 %v3456_v38, %v3456_v38  ;;  %v1823_v56 = vmul.f32 0.0208351, %v1815_v17  ;;  %v1830_v27 = vadd.f32 -0.085133, %v1822_v3  ;;  %v1837_v39 = vmul.f32 %v1829_v11, %v3428_v54 }
 0x42d   : > { %v1802_v19 = vmul.f32 %v2364_v31, %v1794_v14  ;;  %v3469_v9 = vsel %vm3437_vm8, %v1801_v23, %v3358_v46  ;;  %v1844_v40 = vadd.f32 0.180141, %v1836_v22  ;;  %v1851_v12 = vmul.f32 %v1843_v62, %v3401_v15 }
 0x42e   : > { %v1817_v53 = vmul.f32 %v3469_v9, %v3469_v9  ;;  %v1824_v42 = vmul.f32 0.0208351, %v1816_v7  ;;  %v1831_v36 = vadd.f32 -0.085133, %v1823_v56  ;;  %v1838_v10 = vmul.f32 %v1830_v27, %v1814_v57 }
 0x42f   : > { %v3476_v50 = vsel %vm3462_vm9, %v1802_v19, %v3361_v51  ;;  %v1845_v47 = vadd.f32 0.180141, %v1837_v39  ;;  %v1852_v41 = vmul.f32 %v1844_v40, %v3416_v33  ;;  %v1859_v40 = vadd.f32 -0.3302995, %v1851_v12 }
 0x430   : > { %v1818_v34 = vmul.f32 %v3476_v50, %v3476_v50  ;;  %v1825_v24 = vmul.f32 0.0208351, %v1817_v53  ;;  %v1832_v44 = vadd.f32 -0.085133, %v1824_v42  ;;  %v1839_v20 = vmul.f32 %v1831_v36, %v1815_v17 }
 0x431   : > { %v1846_v29 = vadd.f32 0.180141, %v1838_v10  ;;  %v1853_v28 = vmul.f32 %v1845_v47, %v3428_v54  ;;  %v1860_v23 = vadd.f32 -0.3302995, %v1852_v41  ;;  %v1902_v2 = vsel %vm1894_vm15, -1.5707964, %v2462_v43 }
 0x432   : > { %v1826_v25 = vmul.f32 0.0208351, %v1818_v34  ;;  %v1833_v13 = vadd.f32 -0.085133, %v1825_v24  ;;  %v1840_v31 = vmul.f32 %v1832_v44, %v1816_v7  ;;  %v1847_v52 = vadd.f32 0.180141, %v1839_v20 }
 0x433   : > { %v1854_v61 = vmul.f32 %v1846_v29, %v1814_v57  ;;  %v1861_v14 = vadd.f32 -0.3302995, %v1853_v28  ;;  %v1868_v29 = vmul.f32 %v1860_v23, %v3416_v33  ;;  %v1867_v28 = vmul.f32 %v1859_v40, %v3401_v15 }
 0x434   : > { %v1834_v18 = vadd.f32 -0.085133, %v1826_v25  ;;  %v1841_v48 = vmul.f32 %v1833_v13, %v1817_v53  ;;  %v1848_v3 = vadd.f32 0.180141, %v1840_v31  ;;  %v1855_v11 = vmul.f32 %v1847_v52, %v1815_v17 }
 0x435   : > { %v1862_v22 = vadd.f32 -0.3302995, %v1854_v61  ;;  %v1869_v24 = vmul.f32 %v1861_v14, %v3428_v54  ;;  %v1876_v52 = vadd.f32 0.999866, %v1868_v29 }
 0x436   : > { %v1842_v55 = vmul.f32 %v1834_v18, %v1818_v34  ;;  %v1849_v56 = vadd.f32 0.180141, %v1841_v48  ;;  %v1856_v27 = vmul.f32 %v1848_v3, %v1816_v7  ;;  %v1863_v39 = vadd.f32 -0.3302995, %v1855_v11 }
 0x437   : > { %v1870_v19 = vmul.f32 %v1862_v22, %v1814_v57  ;;  %v1877_v54 = vadd.f32 0.999866, %v1869_v24  ;;  %v1906_v11 = vsel %vm1898_vm1, -1.5707964, %v2462_v43 }
 0x438   : > { %v1850_v42 = vadd.f32 0.180141, %v1842_v55  ;;  %v1857_v36 = vmul.f32 %v1849_v56, %v1817_v53  ;;  %v1864_v10 = vadd.f32 -0.3302995, %v1856_v27  ;;  %v1871_v47 = vmul.f32 %v1863_v39, %v1815_v17 }
 0x439   : > { %v1878_v31 = vadd.f32 0.999866, %v1870_v19  ;;  %v1885_v48 = vmul.f32 %v1877_v54, %v3423_v58  ;;  %v1901_v58 = vsel %vm1893_vm0, -1.5707964, %v2462_v43 }
 0x43a   : > { %v1858_v62 = vmul.f32 %v1850_v42, %v1818_v34  ;;  %v1865_v44 = vadd.f32 -0.3302995, %v1857_v36  ;;  %v1872_v20 = vmul.f32 %v1864_v10, %v1816_v7  ;;  %v1879_v25 = vadd.f32 0.999866, %v1871_v47 }
 0x43b   : > { %v1886_v18 = vmul.f32 %v1878_v31, %v3435_v26  ;;  %v1884_v26 = vmul.f32 %v1876_v52, %v3407_v60  ;;  %v1909_v23 = vsub.f32 %v1901_v58, %v1885_v48  ;;  %v1900_v60 = vsel %vm1892_vm10, -1.5707964, %v2462_v43 }
 0x43c   : > { %v1866_v57 = vadd.f32 -0.3302995, %v1858_v62  ;;  %v1873_v41 = vmul.f32 %v1865_v44, %v1817_v53  ;;  %v1880_v13 = vadd.f32 0.999866, %v1872_v20  ;;  %v1887_v15 = vmul.f32 %v1879_v25, %v3448_v30  ;;  %v2085_v62 = vpop.permute.xlu0 %2084 }
 0x43d   : > { %v1875_v53 = vadd.f32 0.999866, %v1867_v28  ;;  %v1904_v30 = vsel %vm1896_vm13, -1.5707964, %v2462_v43  ;;  %v1910_v63 = vsub.f32 %v1902_v2, %v1886_v18  ;;  %v1908_v55 = vsub.f32 %v1900_v60, %v1884_v26 }
 0x43e   : > { %v1874_v17 = vmul.f32 %v1866_v57, %v1818_v34  ;;  %v1881_v33 = vadd.f32 0.999866, %v1873_v41  ;;  %v1888_v7 = vmul.f32 %v1880_v13, %v3456_v38  ;;  %v1905_v34 = vsel %vm1897_vm12, -1.5707964, %v2462_v43 }
 0x43f   : > { %v1903_v38 = vsel %vm1895_vm14, -1.5707964, %v2462_v43  ;;  %v1883_v22 = vmul.f32 %v1875_v53, %v3385_v1  ;;  %v1918_v8 = vsel %vm3391_vm5, %v1910_v63, %v1886_v18  ;;  %v1917_v49 = vsel %vm3395_vm6, %v1909_v23, %v1885_v48 }
 0x440   : > { %v1882_v61 = vadd.f32 0.999866, %v1874_v17  ;;  %v1889_v12 = vmul.f32 %v1881_v33, %v3469_v9  ;;  %v1912_v9 = vsub.f32 %v1904_v30, %v1888_v7  ;;  %v1911_v46 = vsub.f32 %v1903_v38, %v1887_v15 }
 0x441   : > { %v1907_v27 = vsub.f32 %v1899_v21, %v1883_v22  ;;  %v1916_v5 = vsel %vm3373_vm4, %v1908_v55, %v1884_v26  ;;  %v1928_v43 = vmul.f32 %v1918_v8, %v1918_v8  ;;  %v1927_v40 = vmul.f32 %v1917_v49, %v1917_v49 }
 0x442   : > { %v1890_v51 = vmul.f32 %v1882_v61, %v3476_v50  ;;  %v1913_v3 = vsub.f32 %v1905_v34, %v1889_v12  ;;  %v1920_v1 = vsel %vm3410_vm7, %v1912_v9, %v1888_v7  ;;  %v1919_v4 = vsel %vm3387_vm3, %v1911_v46, %v1887_v15 }
 0x443   : > { %v1930_v32 = vmul.f32 %v1920_v1, %v1920_v1  ;;  %v1929_v19 = vmul.f32 %v1919_v4, %v1919_v4  ;;  %v1915_v16 = vsel %vm3377_vm2, %v1907_v27, %v1883_v22  ;;  %v1926_v59 = vmul.f32 %v1916_v5, %v1916_v5 }
 0x444   : > { %v1914_v14 = vsub.f32 %v1906_v11, %v1890_v51  ;;  %v1921_v50 = vsel %vm3437_vm8, %v1913_v3, %v1889_v12  ;;  %v1925_v42 = vmul.f32 %v1915_v16, %v1915_v16  ;;  %vm3677_vm4 = vcmask 261120  }
 0x445   : > { %v1931_v39 = vmul.f32 %v1921_v50, %v1921_v50  ;;  %vm3678_vm2 = vmmov %vm3677_vm4 }
 0x446   : > { %v1922_v37 = vsel %vm3462_vm9, %v1914_v14, %v1890_v51 }
 0x447   : > { %v1932_v56 = vmul.f32 %v1922_v37, %v1922_v37 }
 0x449   : > { %1960 = vmatprep.subr.mxu1 %v1932_v56 }
 0x44a   : > { %1961 = vmatpush1.msra.mxu1 %v1931_v39 }
 0x44b   : > { %1962 = vmatprep.subr.mxu1 %v1930_v32 }
 0x44c   : > { %1963 = vmatpush1.msra.mxu1 %v1929_v19 }
 0x44d   : > { %1964 = vmatprep.subr.mxu1 %v1928_v43 }
 0x44e   : > { %1965 = vmatpush1.msra.mxu1 %v1927_v40 }
 0x44f   : > { %1966 = vmatprep.subr.mxu1 %v1926_v59 }
 0x450   : > { %1967 = vmatpush1.msra.mxu1 %v1925_v42 }
 0x451   : > { %2034 = vmatprep.subr.mxu1 %v1922_v37  ;;  %2236 = vmatmul.mubr.msk.f32.vlgmr.msra.gmra.mxu1 %vm3677_vm4, %v1924_v35 }
 0x452   : > { %2035 = vmatpush1.msra.mxu1 %v1921_v50  ;;  %2074 = vmatprep.mubr.f32.mxu1 %v2460_v0 }
 0x453   : > { %2036 = vmatprep.subr.mxu1 %v1920_v1 }
 0x454   : > { %2037 = vmatpush1.msra.mxu1 %v1919_v4 }
 0x455   : > { %2038 = vmatprep.subr.mxu1 %v1918_v8 }
 0x456   : > { %2039 = vmatpush1.msra.mxu1 %v1917_v49 }
 0x457   : > { %2040 = vmatprep.subr.mxu1 %v1916_v5 }
 0x458   : > { %2041 = vmatpush1.msra.mxu1 %v1915_v16 }
 0x459   : > { %2237 = vmatmul.mubr.msk.f32.vlgmr.msra.gmra.mxu1 %vm3678_vm2, %v1923_v6 }
 0x511   : > { %v2002_v45 = vpop.f32.mrf.mxu1 }
 0x513   : > { %v2004_v36 = vpop.f32.mrf.mxu1 }
 0x519   : > { %v2076_v10 = vpop.f32.mrf.mxu1 }
 0x51a   : > { %v2077_v47 = vadd.f32 %v2076_v10, %v2002_v45 }
 0x51b   : > { %v2078_v0 = vpop.f32.mrf.mxu1 }
 0x51c   : > { %v2079_v24 = vadd.f32 %v2078_v0, %v2004_v36  ;;  %v2087_v44 = vadd.f32 %v2085_v62, %v2077_v47 }
 0x51e   : > { %v2088_v20 = vadd.f32 %v2085_v62, %v2079_v24 }
 0x520   : > { %v2091_v29 = vcombine.low %v2087_v44, %v2088_v20 }
 0x522   : > { %2093 = vst [vmem:[%s341_s23] sm:$0x77] %v2091_v29 }
 0x523   : > { %2404 = shalt.err (!%p2401_p0)
}
 0x524   : > { %s2405_s21 = scalar_lea.hbm %s2107_s27, 128  ;;  %s2409_s23 = scalar_lea.hbm %s3592_s9, 256 }
 0x525   : > { %p2406_p1 = scmp.ne.s32.totalorder %s2107_s27, %s2405_s21  ;;  %p2410_p4 = scmp.lt.s32.totalorder %s2107_s27, %s3592_s9 }
 0x526   : > { %p2411_p7 = scmp.lt.s32.totalorder %s2409_s23, %s2405_s21 }
 0x527   : > { %p2407_p2 = pnand %p2406_p1, %p2552_p5 }
 0x528   : > { %p2412_p8 = por %p2411_p7, %p2410_p4 }
 0x529   : > { %p2408_p3 = pneg %p2407_p2 }
 0x52b   : > { %p2413_p6 = pnand %p2412_p8, %p2408_p3 }
 0x52d   : > { %2416 = shalt.err (!%p2413_p6)
}
 0x52e   : > { %2248 = dma.vmem_to_hbm [thread:$0]  (%p2552_p5), %s2110_s24, 128, %s2107_s27, %s2095_s28  }
 0x52f PF: > { %p2260_p9 = scmp.ge.s32.totalorder %s2455_s12, 2  ;;  %s2121_s29 = sand.u32 1, %s2443_s30  }
 0x530   : > { %p3679_p10 = scmp.ne.s32.totalorder %s3595_s20, 0  ;;  %s2122_s14 = scalar_lea.sflag [#allocation4], %s2121_s29 }
 0x532   : > { %p2255_p11 = pnand %p2260_p9, %p3679_p10 }
 0x534   : > { %p2256_p12 = pneg %p2255_p11 }
 0x536   : > { %2438 = dma.done.wait (%p2256_p12), %s2122_s14, 128  }
 0x537   : > { %2440 = vsyncadd (%p2256_p12), %s2122_s14, 4294967168  ;;  %p20_p13 = scmp.ge.s32.totalorder %s2539_s15, 4   ;;  %s3680_s30 = smov %s2447_s10 }
 0x538   : > { %s3681_s10 = smov %s2451_s11  ;;  %s3682_s11 = smov %s2550_s18 }
 0x539   : > { %s3683_s12 = smov %s2539_s15  ;;  %22 = sbr.rel (!%p20_p13) target bundleno = 4 (0x4), region = 102 }
 0x53e   :  { %2127 = vsyncpa [#allocation3], 1 }
 0x53f   :  { %2129 = vsyncpa [#allocation3 + $0x1], 1 }
 0x540   :  { %2130 = vsyncpa [#allocation4], 1 }
 0x541   :  { %2132 = vsyncpa [#allocation4 + $0x1], 1 }

</bundles_post_ra>
